<compile_context>
chip_gen: v6e
topology: v6e:2x2x1
jax: 0.10.0
libtpu: 0.0.40
codegen_flags: <defaults>
</compile_context>

<pallas_src>
import functools
import math

import jax
import jax.numpy as jnp
import numpy as np
from jax.experimental import pallas as pl
from jax.experimental.pallas import tpu as pltpu


def _round_up(v, m):
    return (v + m - 1) // m * m


def _tile_plan(n, tm, tk):
    """Clamp tiles to the (128-rounded) node count and pad N so both divide."""
    n128 = _round_up(n, 128)
    tm = min(tm, n128)
    tk = min(tk, n128)
    n_p = _round_up(n, math.lcm(tm, tk))
    return tm, tk, n_p


def _vmem_limit(byte_terms, *, headroom=4 << 20, floor=32 << 20, cap=56 << 20):
    # Explicit scoped-VMEM budget: v5e default is only 16 MiB, v6e/v7x 32 MiB;
    # cap below v7x's 64 MiB physical so the double-buffer pipeline survives.
    need = int(sum(byte_terms)) + headroom
    return int(min(max(need, floor), cap))


# --------------------------------------------------------------- kernels ----

def _transform_kernel(x_ref, w_ref, o_ref):
    # support = x @ W  for one row-tile of nodes (weights fully resident).
    o_ref[...] = jnp.dot(
        x_ref[...], w_ref[...], preferred_element_type=jnp.float32
    ).astype(o_ref.dtype)


def _gc1_fused_kernel(adj_ref, sup_ref, b1_ref, w2_ref, o_ref, acc_ref, *, tk):
    # acc[i]  = b1 + sum_k adj[i, k_tile] @ support[k_tile]        (f32)
    # o[i]    = relu(acc[i]) @ W2            (fused second transform, bf16 out)
    k = pl.program_id(1)

    @pl.when(k == 0)
    def _():
        acc_ref[...] = jnp.broadcast_to(
            b1_ref[...].astype(jnp.float32), acc_ref.shape)

    ks = pl.multiple_of(k * tk, tk)
    acc_ref[...] += jnp.dot(
        adj_ref[...], sup_ref[pl.ds(ks, tk), :],
        preferred_element_type=jnp.float32)

    @pl.when(k == pl.num_programs(1) - 1)
    def _():
        h = jnp.maximum(acc_ref[...], 0.0).astype(w2_ref.dtype)
        o_ref[...] = jnp.dot(
            h, w2_ref[...], preferred_element_type=jnp.float32
        ).astype(o_ref.dtype)


def _gc2_kernel(adj_ref, sup_ref, b2_ref, o_ref, acc_ref, *, tk):
    # out[i] = b2 + sum_k adj[i, k_tile] @ s2[k_tile]   (no activation)
    k = pl.program_id(1)

    @pl.when(k == 0)
    def _():
        acc_ref[...] = jnp.broadcast_to(
            b2_ref[...].astype(jnp.float32), acc_ref.shape)

    ks = pl.multiple_of(k * tk, tk)
    acc_ref[...] += jnp.dot(
        adj_ref[...], sup_ref[pl.ds(ks, tk), :],
        preferred_element_type=jnp.float32)

    @pl.when(k == pl.num_programs(1) - 1)
    def _():
        o_ref[...] = acc_ref[...].astype(o_ref.dtype)


# -------------------------------------------------------------- wrappers ----

def _dense_transform(x, w, *, out_dtype, tm):
    """support = x @ w, row-tiled over nodes (weights resident)."""
    n_p, f_p = x.shape
    h_p = w.shape[1]
    vmem = _vmem_limit([
        2 * tm * f_p * x.dtype.itemsize,                 # x row tiles (2-buf)
        2 * f_p * h_p * w.dtype.itemsize,                # resident weights
        2 * tm * h_p * jnp.dtype(out_dtype).itemsize,    # output tiles
    ])
    return pl.pallas_call(
        _transform_kernel,
        out_shape=jax.ShapeDtypeStruct((n_p, h_p), out_dtype),
        grid=(n_p // tm,),
        in_specs=[
            pl.BlockSpec((tm, f_p), lambda i: (i, 0)),
            pl.BlockSpec((f_p, h_p), lambda i: (0, 0)),
        ],
        out_specs=pl.BlockSpec((tm, h_p), lambda i: (i, 0)),
        compiler_params=pltpu.CompilerParams(
            dimension_semantics=("parallel",),
            vmem_limit_bytes=vmem),
    )(x, w)


def _gc1_fused(adj, support, b1, w2, *, out_dtype, tm, tk):
    """relu(adj @ support + b1) @ W2, adj streamed, support/W2 VMEM-resident."""
    n_p = adj.shape[0]
    h1_p = support.shape[1]
    h2_p = w2.shape[1]
    kernel = functools.partial(_gc1_fused_kernel, tk=tk)
    vmem = _vmem_limit([
        2 * tm * tk * adj.dtype.itemsize,                # streamed adj tiles
        2 * n_p * h1_p * support.dtype.itemsize,         # resident support
        2 * h1_p * h2_p * w2.dtype.itemsize,             # resident W2
        2 * tm * h2_p * jnp.dtype(out_dtype).itemsize,   # output tiles
        tm * h1_p * 4,                                   # f32 accumulator
    ])
    return pl.pallas_call(
        kernel,
        out_shape=jax.ShapeDtypeStruct((n_p, h2_p), out_dtype),
        grid=(n_p // tm, n_p // tk),
        in_specs=[
            pl.BlockSpec((tm, tk), lambda i, k: (i, k)),      # adj (streamed)
            pl.BlockSpec((n_p, h1_p), lambda i, k: (0, 0)),   # support (resident)
            pl.BlockSpec((1, h1_p), lambda i, k: (0, 0)),     # b1 (f32)
            pl.BlockSpec((h1_p, h2_p), lambda i, k: (0, 0)),  # W2 (resident)
        ],
        out_specs=pl.BlockSpec((tm, h2_p), lambda i, k: (i, 0)),
        scratch_shapes=[pltpu.VMEM((tm, h1_p), jnp.float32)],
        compiler_params=pltpu.CompilerParams(
            dimension_semantics=("parallel", "arbitrary"),
            vmem_limit_bytes=vmem),
    )(adj, support, b1, w2)


def _gc2(adj, support, b2, *, out_dtype, tm, tk):
    """adj @ support + b2, adj streamed, support VMEM-resident."""
    n_p = adj.shape[0]
    h_p = support.shape[1]
    kernel = functools.partial(_gc2_kernel, tk=tk)
    vmem = _vmem_limit([
        2 * tm * tk * adj.dtype.itemsize,
        2 * n_p * h_p * support.dtype.itemsize,
        2 * tm * h_p * jnp.dtype(out_dtype).itemsize,
        tm * h_p * 4,
    ])
    return pl.pallas_call(
        kernel,
        out_shape=jax.ShapeDtypeStruct((n_p, h_p), out_dtype),
        grid=(n_p // tm, n_p // tk),
        in_specs=[
            pl.BlockSpec((tm, tk), lambda i, k: (i, k)),    # adj (streamed)
            pl.BlockSpec((n_p, h_p), lambda i, k: (0, 0)),  # s2 (resident)
            pl.BlockSpec((1, h_p), lambda i, k: (0, 0)),    # b2 (f32)
        ],
        out_specs=pl.BlockSpec((tm, h_p), lambda i, k: (i, 0)),
        scratch_shapes=[pltpu.VMEM((tm, h_p), jnp.float32)],
        compiler_params=pltpu.CompilerParams(
            dimension_semantics=("parallel", "arbitrary"),
            vmem_limit_bytes=vmem),
    )(adj, support, b2)


def prepare_adj(adj, n, *, tm=512, tk=1024, compute_dtype=jnp.bfloat16):
    """Pad + cast the (static per-graph) adjacency ONCE; reuse across calls."""
    _, _, n_p = _tile_plan(n, tm, tk)
    return jnp.pad(
        adj, ((0, n_p - adj.shape[0]), (0, n_p - adj.shape[1]))
    ).astype(compute_dtype)


def gpn_encoder(x, adj, w1, b1, w2, b2, *, tm=512, tk=1024,
                compute_dtype=jnp.bfloat16):
    """Forward pass of GPN_Encoder (eval mode: dropout is identity).

    `adj` may be either the raw (N, N) f32 adjacency or the output of
    prepare_adj() (padded + cast), in which case the per-call N^2 pad/cast
    is skipped entirely.
    """
    n, f = x.shape
    h1 = w1.shape[1]
    h2 = w2.shape[1]

    tm, tk, n_p = _tile_plan(n, tm, tk)
    f_p = _round_up(f, 128)
    h1_p = _round_up(h1, 128)
    h2_p = _round_up(h2, 128)

    pad2 = lambda a, r, c: jnp.pad(a, ((0, r - a.shape[0]), (0, c - a.shape[1])))

    x_p = pad2(x, n_p, f_p).astype(compute_dtype)
    if adj.shape == (n_p, n_p) and adj.dtype == jnp.dtype(compute_dtype):
        adj_p = adj                      # already prepared (hoisted per-graph)
    else:
        adj_p = pad2(adj, n_p, n_p).astype(compute_dtype)
    w1_p = pad2(w1, f_p, h1_p).astype(compute_dtype)
    w2_p = pad2(w2, h1_p, h2_p).astype(compute_dtype)
    b1_p = pad2(b1, 1, h1_p).astype(jnp.float32)
    b2_p = pad2(b2, 1, h2_p).astype(jnp.float32)

    # Note: padded node rows of the hidden state equal relu(b1) @ W2 (bias is
    # added to zero rows).  This never contaminates the returned output
    # because the corresponding adj columns are zero and we slice to [:n].

    # s1 = x @ W1
    s1 = _dense_transform(x_p, w1_p, out_dtype=compute_dtype, tm=tm)
    # s2 = relu(adj @ s1 + b1) @ W2   (gc1 + relu + fused second transform;
    #                                  dropout is identity in eval mode)
    s2 = _gc1_fused(adj_p, s1, b1_p, w2_p, out_dtype=compute_dtype,
                    tm=tm, tk=tk)
    # out = adj @ s2 + b2             (gc2)
    out = _gc2(adj_p, s2, b2_p, out_dtype=jnp.float32, tm=tm, tk=tk)

    return out[:n, :h2]


# ----------------------------------------------------------------- params ---

def init_params(key, nfeat, nhid):
    # GraphConvolution init: uniform(-stdv, stdv), stdv = 1/sqrt(out_features)
    k1, k2, k3, k4 = jax.random.split(key, 4)
    h1 = 2 * nhid
    stdv1 = 1.0 / np.sqrt(h1)
    stdv2 = 1.0 / np.sqrt(nhid)
    w1 = jax.random.uniform(k1, (nfeat, h1), jnp.float32, -stdv1, stdv1)
    b1 = jax.random.uniform(k2, (1, h1), jnp.float32, -stdv1, stdv1)
    w2 = jax.random.uniform(k3, (h1, nhid), jnp.float32, -stdv2, stdv2)
    b2 = jax.random.uniform(k4, (1, nhid), jnp.float32, -stdv2, stdv2)
    return w1, b1, w2, b2


def reference(x, adj, w1, b1, w2, b2):
    h1 = jnp.maximum(adj @ (x @ w1) + b1, 0.0)
    return adj @ (h1 @ w2) + b2


if __name__ == "__main__":
    key = jax.random.PRNGKey(0)
    # Small but non-trivial shapes (exercise node/feature padding).
    N, nfeat, nhid = 200, 37, 64

    kx, kadj, kp = jax.random.split(key, 3)
    x = jax.random.normal(kx, (N, nfeat), jnp.float32)
    # symmetric, row-normalized dense adjacency
    a = jax.random.uniform(kadj, (N, N), jnp.float32)
    adj = (a + a.T) * 0.5
    adj = adj / jnp.sum(adj, axis=1, keepdims=True)

    w1, b1, w2, b2 = init_params(kp, nfeat, nhid)

    # Hoist the per-graph adjacency pad + bf16 cast out of the forward call.
    adj_prepared = jax.block_until_ready(prepare_adj(adj, N))

    fwd = jax.jit(gpn_encoder)
    out = fwd(x, adj_prepared, w1, b1, w2, b2)
    out = jax.block_until_ready(out)

    ref = reference(x, adj, w1, b1, w2, b2)
    # bf16 inputs with f32 accumulation -> relaxed tolerance vs f32 reference.
    np.testing.assert_allclose(np.asarray(out), np.asarray(ref),
                               rtol=2e-2, atol=2e-2)
    print("KERNEL_OK")
</pallas_src>

<mosaic_0001>
module attributes {stable_mosaic.version = 11 : i64} {
  func.func @_transform_kernel(%arg0: i32, %arg1: memref<256x128xbf16, #tpu.memory_space<vmem>>, %arg2: memref<128x128xbf16, #tpu.memory_space<vmem>>, %arg3: memref<256x128xbf16, #tpu.memory_space<vmem>>) attributes {dimension_semantics = [#tpu.dimension_semantics<parallel>], iteration_bounds = array<i64: 1>, scalar_prefetch = 0 : i64, scratch_operands = 0 : i64, tpu.core_type = #tpu.core_type<tc>, window_params = [{transform_indices = @transform_0, window_bounds = array<i64: 256, 128>}, {pipeline_mode = #tpu.pipeline_mode<synchronous>, transform_indices = @transform_1, window_bounds = array<i64: 128, 128>}, {transform_indices = @transform_2, window_bounds = array<i64: 256, 128>}]} {
    %c0 = arith.constant 0 : index
    %c0_0 = arith.constant 0 : index
    %0 = vector.load %arg1[%c0, %c0_0] : memref<256x128xbf16, #tpu.memory_space<vmem>>, vector<256x128xbf16>
    %c0_1 = arith.constant 0 : index
    %c0_2 = arith.constant 0 : index
    %1 = vector.load %arg2[%c0_1, %c0_2] : memref<128x128xbf16, #tpu.memory_space<vmem>>, vector<128x128xbf16>
    %cst = arith.constant dense<0.000000e+00> : vector<256x128xf32>
    %2 = tpu.matmul %0, %1, %cst {dimension_numbers = #tpu.dot_dimension_numbers<[1], [0], [0], [1], [0, 0, 1, 1], [], []>} : vector<256x128xbf16>, vector<128x128xbf16>, vector<256x128xf32> -> vector<256x128xf32>
    %3 = arith.truncf %2 : vector<256x128xf32> to vector<256x128xbf16>
    %c0_3 = arith.constant 0 : index
    %c0_4 = arith.constant 0 : index
    %4 = vector.load %arg3[%c0_3, %c0_4] : memref<256x128xbf16, #tpu.memory_space<vmem>>, vector<256x128xbf16>
    tpu.vector_store %arg3[%c0_3, %c0_4], %3 {strides = array<i32>} : memref<256x128xbf16, #tpu.memory_space<vmem>>, vector<256x128xbf16>,
    return
  }
  func.func @transform_0(%arg0: i32) -> (i32, i32) {
    %c0_i32 = arith.constant 0 : i32
    %c0_i32_0 = arith.constant 0 : i32
    return %arg0, %c0_i32 : i32, i32
  }
  func.func @transform_1(%arg0: i32) -> (i32, i32) {
    %c0_i32 = arith.constant 0 : i32
    %c0_i32_0 = arith.constant 0 : i32
    %c0_i32_1 = arith.constant 0 : i32
    return %c0_i32, %c0_i32_0 : i32, i32
  }
  func.func @transform_2(%arg0: i32) -> (i32, i32) {
    %c0_i32 = arith.constant 0 : i32
    %c0_i32_0 = arith.constant 0 : i32
    return %arg0, %c0_i32 : i32, i32
  }
}

module attributes {stable_mosaic.version = 11 : i64} {
  func.func @_gc1_fused_kernel(%arg0: i32, %arg1: i32, %arg2: memref<256x256xbf16, #tpu.memory_space<vmem>>, %arg3: memref<256x128xbf16, #tpu.memory_space<vmem>>, %arg4: memref<1x128xf32, #tpu.memory_space<vmem>>, %arg5: memref<128x128xbf16, #tpu.memory_space<vmem>>, %arg6: memref<256x128xbf16, #tpu.memory_space<vmem>>, %arg7: memref<256x128xf32, #tpu.memory_space<vmem>>) attributes {dimension_semantics = [#tpu.dimension_semantics<parallel>, #tpu.dimension_semantics<arbitrary>], iteration_bounds = array<i64: 1, 1>, scalar_prefetch = 0 : i64, scratch_operands = 1 : i64, tpu.core_type = #tpu.core_type<tc>, window_params = [{transform_indices = @transform_0, window_bounds = array<i64: 256, 256>}, {pipeline_mode = #tpu.pipeline_mode<synchronous>, transform_indices = @transform_1, window_bounds = array<i64: 256, 128>}, {pipeline_mode = #tpu.pipeline_mode<synchronous>, transform_indices = @transform_2, window_bounds = array<i64: 1, 128>}, {pipeline_mode = #tpu.pipeline_mode<synchronous>, transform_indices = @transform_3, window_bounds = array<i64: 128, 128>}, {transform_indices = @transform_4, window_bounds = array<i64: 256, 128>}]} {
    %c0_i32 = arith.constant 0 : i32
    %0 = arith.cmpi eq, %arg1, %c0_i32 : i32
    %1 = arith.extui %0 : i1 to i32
    %c0_i32_0 = arith.constant 0 : i32
    %2 = arith.cmpi ne, %1, %c0_i32_0 : i32
    scf.if %2 {
      %c0_9 = arith.constant 0 : index
      %c0_10 = arith.constant 0 : index
      %15 = vector.load %arg4[%c0_9, %c0_10] : memref<1x128xf32, #tpu.memory_space<vmem>>, vector<1x128xf32>
      %16 = vector.shape_cast %15 : vector<1x128xf32> to vector<1x128xf32>
      %17 = vector.broadcast %16 : vector<1x128xf32> to vector<256x128xf32>
      %c0_11 = arith.constant 0 : index
      %c0_12 = arith.constant 0 : index
      %18 = vector.load %arg7[%c0_11, %c0_12] : memref<256x128xf32, #tpu.memory_space<vmem>>, vector<256x128xf32>
      tpu.vector_store %arg7[%c0_11, %c0_12], %17 {strides = array<i32>} : memref<256x128xf32, #tpu.memory_space<vmem>>, vector<256x128xf32>,
    } else {
    }
    %c256_i32 = arith.constant 256 : i32
    %3 = arith.muli %arg1, %c256_i32 : i32
    %4 = tpu.assume_multiple %3, 256 : i32
    %c0 = arith.constant 0 : index
    %c0_1 = arith.constant 0 : index
    %5 = vector.load %arg7[%c0, %c0_1] : memref<256x128xf32, #tpu.memory_space<vmem>>, vector<256x128xf32>
    %c0_2 = arith.constant 0 : index
    %c0_3 = arith.constant 0 : index
    %6 = vector.load %arg2[%c0_2, %c0_3] : memref<256x256xbf16, #tpu.memory_space<vmem>>, vector<256x256xbf16>
    %7 = arith.index_cast %4 : i32 to index
    %c0_4 = arith.constant 0 : index
    %8 = vector.load %arg3[%7, %c0_4] : memref<256x128xbf16, #tpu.memory_space<vmem>>, vector<256x128xbf16>
    %cst = arith.constant dense<0.000000e+00> : vector<256x128xf32>
    %9 = tpu.matmul %6, %8, %cst {dimension_numbers = #tpu.dot_dimension_numbers<[1], [0], [0], [1], [0, 0, 1, 1], [], []>} : vector<256x256xbf16>, vector<256x128xbf16>, vector<256x128xf32> -> vector<256x128xf32>
    %10 = arith.addf %5, %9 : vector<256x128xf32>
    %c0_5 = arith.constant 0 : index
    %c0_6 = arith.constant 0 : index
    %11 = vector.load %arg7[%c0_5, %c0_6] : memref<256x128xf32, #tpu.memory_space<vmem>>, vector<256x128xf32>
    tpu.vector_store %arg7[%c0_5, %c0_6], %10 {strides = array<i32>} : memref<256x128xf32, #tpu.memory_space<vmem>>, vector<256x128xf32>,
    %c0_i32_7 = arith.constant 0 : i32
    %12 = arith.cmpi eq, %arg1, %c0_i32_7 : i32
    %13 = arith.extui %12 : i1 to i32
    %c0_i32_8 = arith.constant 0 : i32
    %14 = arith.cmpi ne, %13, %c0_i32_8 : i32
    scf.if %14 {
      %c0_9 = arith.constant 0 : index
      %c0_10 = arith.constant 0 : index
      %15 = vector.load %arg7[%c0_9, %c0_10] : memref<256x128xf32, #tpu.memory_space<vmem>>, vector<256x128xf32>
      %cst_11 = arith.constant 0.000000e+00 : f32
      %16 = vector.broadcast %cst_11 : f32 to vector<256x128xf32>
      %17 = arith.maximumf %15, %16 : vector<256x128xf32>
      %18 = arith.truncf %17 : vector<256x128xf32> to vector<256x128xbf16>
      %c0_12 = arith.constant 0 : index
      %c0_13 = arith.constant 0 : index
      %19 = vector.load %arg5[%c0_12, %c0_13] : memref<128x128xbf16, #tpu.memory_space<vmem>>, vector<128x128xbf16>
      %cst_14 = arith.constant dense<0.000000e+00> : vector<256x128xf32>
      %20 = tpu.matmul %18, %19, %cst_14 {dimension_numbers = #tpu.dot_dimension_numbers<[1], [0], [0], [1], [0, 0, 1, 1], [], []>} : vector<256x128xbf16>, vector<128x128xbf16>, vector<256x128xf32> -> vector<256x128xf32>
      %21 = arith.truncf %20 : vector<256x128xf32> to vector<256x128xbf16>
      %c0_15 = arith.constant 0 : index
      %c0_16 = arith.constant 0 : index
      %22 = vector.load %arg6[%c0_15, %c0_16] : memref<256x128xbf16, #tpu.memory_space<vmem>>, vector<256x128xbf16>
      tpu.vector_store %arg6[%c0_15, %c0_16], %21 {strides = array<i32>} : memref<256x128xbf16, #tpu.memory_space<vmem>>, vector<256x128xbf16>,
    } else {
    }
    return
  }
  func.func @transform_0(%arg0: i32, %arg1: i32) -> (i32, i32) {
    %c0_i32 = arith.constant 0 : i32
    return %arg0, %arg1 : i32, i32
  }
  func.func @transform_1(%arg0: i32, %arg1: i32) -> (i32, i32) {
    %c0_i32 = arith.constant 0 : i32
    %c0_i32_0 = arith.constant 0 : i32
    %c0_i32_1 = arith.constant 0 : i32
    return %c0_i32, %c0_i32_0 : i32, i32
  }
  func.func @transform_2(%arg0: i32, %arg1: i32) -> (i32, i32) {
    %c0_i32 = arith.constant 0 : i32
    %c0_i32_0 = arith.constant 0 : i32
    %c0_i32_1 = arith.constant 0 : i32
    return %c0_i32, %c0_i32_0 : i32, i32
  }
  func.func @transform_3(%arg0: i32, %arg1: i32) -> (i32, i32) {
    %c0_i32 = arith.constant 0 : i32
    %c0_i32_0 = arith.constant 0 : i32
    %c0_i32_1 = arith.constant 0 : i32
    return %c0_i32, %c0_i32_0 : i32, i32
  }
  func.func @transform_4(%arg0: i32, %arg1: i32) -> (i32, i32) {
    %c0_i32 = arith.constant 0 : i32
    %c0_i32_0 = arith.constant 0 : i32
    return %arg0, %c0_i32 : i32, i32
  }
}

module attributes {stable_mosaic.version = 11 : i64} {
  func.func @_gc2_kernel(%arg0: i32, %arg1: i32, %arg2: memref<256x256xbf16, #tpu.memory_space<vmem>>, %arg3: memref<256x128xbf16, #tpu.memory_space<vmem>>, %arg4: memref<1x128xf32, #tpu.memory_space<vmem>>, %arg5: memref<256x128xf32, #tpu.memory_space<vmem>>, %arg6: memref<256x128xf32, #tpu.memory_space<vmem>>) attributes {dimension_semantics = [#tpu.dimension_semantics<parallel>, #tpu.dimension_semantics<arbitrary>], iteration_bounds = array<i64: 1, 1>, scalar_prefetch = 0 : i64, scratch_operands = 1 : i64, tpu.core_type = #tpu.core_type<tc>, window_params = [{transform_indices = @transform_0, window_bounds = array<i64: 256, 256>}, {pipeline_mode = #tpu.pipeline_mode<synchronous>, transform_indices = @transform_1, window_bounds = array<i64: 256, 128>}, {pipeline_mode = #tpu.pipeline_mode<synchronous>, transform_indices = @transform_2, window_bounds = array<i64: 1, 128>}, {transform_indices = @transform_3, window_bounds = array<i64: 256, 128>}]} {
    %c0_i32 = arith.constant 0 : i32
    %0 = arith.cmpi eq, %arg1, %c0_i32 : i32
    %1 = arith.extui %0 : i1 to i32
    %c0_i32_0 = arith.constant 0 : i32
    %2 = arith.cmpi ne, %1, %c0_i32_0 : i32
    scf.if %2 {
      %c0_9 = arith.constant 0 : index
      %c0_10 = arith.constant 0 : index
      %15 = vector.load %arg4[%c0_9, %c0_10] : memref<1x128xf32, #tpu.memory_space<vmem>>, vector<1x128xf32>
      %16 = vector.shape_cast %15 : vector<1x128xf32> to vector<1x128xf32>
      %17 = vector.broadcast %16 : vector<1x128xf32> to vector<256x128xf32>
      %c0_11 = arith.constant 0 : index
      %c0_12 = arith.constant 0 : index
      %18 = vector.load %arg6[%c0_11, %c0_12] : memref<256x128xf32, #tpu.memory_space<vmem>>, vector<256x128xf32>
      tpu.vector_store %arg6[%c0_11, %c0_12], %17 {strides = array<i32>} : memref<256x128xf32, #tpu.memory_space<vmem>>, vector<256x128xf32>,
    } else {
    }
    %c256_i32 = arith.constant 256 : i32
    %3 = arith.muli %arg1, %c256_i32 : i32
    %4 = tpu.assume_multiple %3, 256 : i32
    %c0 = arith.constant 0 : index
    %c0_1 = arith.constant 0 : index
    %5 = vector.load %arg6[%c0, %c0_1] : memref<256x128xf32, #tpu.memory_space<vmem>>, vector<256x128xf32>
    %c0_2 = arith.constant 0 : index
    %c0_3 = arith.constant 0 : index
    %6 = vector.load %arg2[%c0_2, %c0_3] : memref<256x256xbf16, #tpu.memory_space<vmem>>, vector<256x256xbf16>
    %7 = arith.index_cast %4 : i32 to index
    %c0_4 = arith.constant 0 : index
    %8 = vector.load %arg3[%7, %c0_4] : memref<256x128xbf16, #tpu.memory_space<vmem>>, vector<256x128xbf16>
    %cst = arith.constant dense<0.000000e+00> : vector<256x128xf32>
    %9 = tpu.matmul %6, %8, %cst {dimension_numbers = #tpu.dot_dimension_numbers<[1], [0], [0], [1], [0, 0, 1, 1], [], []>} : vector<256x256xbf16>, vector<256x128xbf16>, vector<256x128xf32> -> vector<256x128xf32>
    %10 = arith.addf %5, %9 : vector<256x128xf32>
    %c0_5 = arith.constant 0 : index
    %c0_6 = arith.constant 0 : index
    %11 = vector.load %arg6[%c0_5, %c0_6] : memref<256x128xf32, #tpu.memory_space<vmem>>, vector<256x128xf32>
    tpu.vector_store %arg6[%c0_5, %c0_6], %10 {strides = array<i32>} : memref<256x128xf32, #tpu.memory_space<vmem>>, vector<256x128xf32>,
    %c0_i32_7 = arith.constant 0 : i32
    %12 = arith.cmpi eq, %arg1, %c0_i32_7 : i32
    %13 = arith.extui %12 : i1 to i32
    %c0_i32_8 = arith.constant 0 : i32
    %14 = arith.cmpi ne, %13, %c0_i32_8 : i32
    scf.if %14 {
      %c0_9 = arith.constant 0 : index
      %c0_10 = arith.constant 0 : index
      %15 = vector.load %arg6[%c0_9, %c0_10] : memref<256x128xf32, #tpu.memory_space<vmem>>, vector<256x128xf32>
      %c0_11 = arith.constant 0 : index
      %c0_12 = arith.constant 0 : index
      %16 = vector.load %arg5[%c0_11, %c0_12] : memref<256x128xf32, #tpu.memory_space<vmem>>, vector<256x128xf32>
      tpu.vector_store %arg5[%c0_11, %c0_12], %15 {strides = array<i32>} : memref<256x128xf32, #tpu.memory_space<vmem>>, vector<256x128xf32>,
    } else {
    }
    return
  }
  func.func @transform_0(%arg0: i32, %arg1: i32) -> (i32, i32) {
    %c0_i32 = arith.constant 0 : i32
    return %arg0, %arg1 : i32, i32
  }
  func.func @transform_1(%arg0: i32, %arg1: i32) -> (i32, i32) {
    %c0_i32 = arith.constant 0 : i32
    %c0_i32_0 = arith.constant 0 : i32
    %c0_i32_1 = arith.constant 0 : i32
    return %c0_i32, %c0_i32_0 : i32, i32
  }
  func.func @transform_2(%arg0: i32, %arg1: i32) -> (i32, i32) {
    %c0_i32 = arith.constant 0 : i32
    %c0_i32_0 = arith.constant 0 : i32
    %c0_i32_1 = arith.constant 0 : i32
    return %c0_i32, %c0_i32_0 : i32, i32
  }
  func.func @transform_3(%arg0: i32, %arg1: i32) -> (i32, i32) {
    %c0_i32 = arith.constant 0 : i32
    %c0_i32_0 = arith.constant 0 : i32
    return %arg0, %c0_i32 : i32, i32
  }
}

</mosaic_0001>

<bundles_post_ra>
// kernel: gpn_encoder.3
= control target key start
LH: loop header
LB: loop body
LE: loop exit
PB: predicated region body
PF: predicated region fallthrough
CT: control target
= control target key end

     0   :  { %s959_s1 = inlined_call_operand.vmem [shape: bf16[128,128], index: 1, kind: input, shape index: {}]   ;;  %s960_s0 = inlined_call_operand.vmem [shape: bf16[256,128], index: 0, kind: input, shape index: {}]   ;;  %s961_s2 = inlined_call_operand.vmem [shape: bf16[256,128], index: 2, kind: output, shape index: {}]  }
   0x1   :  { %v800_v0 = vld [vmem:[%s959_s1 + $0x38] sm:$0xff]   ;;  %v801_v1 = vld [vmem:[%s959_s1 + $0x30] sm:$0xff]   ;;  %v802_v2 = vld [vmem:[%s959_s1 + $0x28] sm:$0xff]  }
   0x2   :  { %736 = vmatprep.subr.bf16.mxu0 %v800_v0  ;;  %784 = vmatprep.subr.bf16.mxu1 %v800_v0  ;;  %v803_v3 = vld [vmem:[%s959_s1 + $0x20] sm:$0xff]   ;;  %v804_v6 = vld [vmem:[%s959_s1 + $0x18] sm:$0xff]   ;;  %v805_v7 = vld [vmem:[%s959_s1 + $0x10] sm:$0xff]  }
   0x3   :  { %737 = vmatpush3.bf16.msra.mxu0 %v800_v0  ;;  %792 = vmatpush3.bf16.msra.mxu1 %v800_v0  ;;  %v808_v4 = vld [vmem:[%s960_s0] sm:$0xff]   ;;  %v806_v8 = vld [vmem:[%s959_s1 + $0x8] sm:$0xff]   ;;  %v812_v12 = vld [vmem:[%s960_s0 + $0x10] sm:$0xff]  }
   0x4   :  { %738 = vmatprep.subr.bf16.mxu0 %v801_v1  ;;  %785 = vmatprep.subr.bf16.mxu1 %v801_v1  ;;  %v809_v5 = vld [vmem:[%s960_s0 + $0x40] sm:$0xff]   ;;  %v810_v10 = vld [vmem:[%s960_s0 + $0x8] sm:$0xff]   ;;  %v813_v13 = vld [vmem:[%s960_s0 + $0x50] sm:$0xff]  }
   0x5   :  { %752 = vmatprep.mubr.bf16.mxu0 %v808_v4  ;;  %768 = vmatprep.mubr.bf16.mxu1 %v809_v5  ;;  %v807_v9 = vld [vmem:[%s959_s1] sm:$0xff]   ;;  %v811_v11 = vld [vmem:[%s960_s0 + $0x48] sm:$0xff]   ;;  %v814_v14 = vld [vmem:[%s960_s0 + $0x18] sm:$0xff]  }
   0x6   :  { %v815_v15 = vld [vmem:[%s960_s0 + $0x58] sm:$0xff]   ;;  %v816_v16 = vld [vmem:[%s960_s0 + $0x20] sm:$0xff]   ;;  %v818_v18 = vld [vmem:[%s960_s0 + $0x28] sm:$0xff]  }
   0x7   :  { %739 = vmatpush3.bf16.msra.mxu0 %v801_v1  ;;  %793 = vmatpush3.bf16.msra.mxu1 %v801_v1  ;;  %v817_v17 = vld [vmem:[%s960_s0 + $0x60] sm:$0xff]   ;;  %v819_v19 = vld [vmem:[%s960_s0 + $0x68] sm:$0xff]   ;;  %v820_v20 = vld [vmem:[%s960_s0 + $0x30] sm:$0xff]  }
   0x8   :  { %740 = vmatprep.subr.bf16.mxu0 %v802_v2  ;;  %786 = vmatprep.subr.bf16.mxu1 %v802_v2  ;;  %v821_v21 = vld [vmem:[%s960_s0 + $0x70] sm:$0xff]   ;;  %v822_v22 = vld [vmem:[%s960_s0 + $0x38] sm:$0xff]  }
   0x9   :  { %v823_v23 = vld [vmem:[%s960_s0 + $0x78] sm:$0xff]  }
   0xb   :  { %741 = vmatpush3.bf16.msra.mxu0 %v802_v2  ;;  %794 = vmatpush3.bf16.msra.mxu1 %v802_v2 }
   0xc   :  { %742 = vmatprep.subr.bf16.mxu0 %v803_v3  ;;  %787 = vmatprep.subr.bf16.mxu1 %v803_v3 }
   0xf   :  { %743 = vmatpush3.bf16.msra.mxu0 %v803_v3  ;;  %795 = vmatpush3.bf16.msra.mxu1 %v803_v3 }
  0x10   :  { %744 = vmatprep.subr.bf16.mxu0 %v804_v6  ;;  %788 = vmatprep.subr.bf16.mxu1 %v804_v6 }
  0x13   :  { %745 = vmatpush3.bf16.msra.mxu0 %v804_v6  ;;  %796 = vmatpush3.bf16.msra.mxu1 %v804_v6 }
  0x14   :  { %746 = vmatprep.subr.bf16.mxu0 %v805_v7  ;;  %789 = vmatprep.subr.bf16.mxu1 %v805_v7 }
  0x17   :  { %747 = vmatpush3.bf16.msra.mxu0 %v805_v7  ;;  %797 = vmatpush3.bf16.msra.mxu1 %v805_v7 }
  0x18   :  { %748 = vmatprep.subr.bf16.mxu0 %v806_v8  ;;  %790 = vmatprep.subr.bf16.mxu1 %v806_v8 }
  0x1b   :  { %749 = vmatpush3.bf16.msra.mxu0 %v806_v8  ;;  %798 = vmatpush3.bf16.msra.mxu1 %v806_v8 }
  0x1c   :  { %750 = vmatprep.subr.bf16.mxu0 %v807_v9  ;;  %791 = vmatprep.subr.bf16.mxu1 %v807_v9 }
  0x1f   :  { %751 = vmatpush3.bf16.msra.mxu0 %v807_v9  ;;  %799 = vmatpush3.bf16.msra.mxu1 %v807_v9 }
  0x22   :  { %753 = vmatmul.mubr.bf16.vlgmr.msra.gmra.mxu0 %v810_v10  ;;  %769 = vmatmul.mubr.bf16.vlgmr.msra.gmra.mxu1 %v811_v11 }
  0x23   :  { %756 = vmatprep.mubr.bf16.mxu0 %v812_v12  ;;  %772 = vmatprep.mubr.bf16.mxu1 %v813_v13 }
  0x2a   :  { %757 = vmatmul.mubr.bf16.gmra.mxu0 %v814_v14  ;;  %773 = vmatmul.mubr.bf16.gmra.mxu1 %v815_v15 }
  0x2b   :  { %760 = vmatprep.mubr.bf16.mxu0 %v816_v16  ;;  %776 = vmatprep.mubr.bf16.mxu1 %v817_v17 }
  0x32   :  { %761 = vmatmul.mubr.bf16.gmra.mxu0 %v818_v18  ;;  %777 = vmatmul.mubr.bf16.gmra.mxu1 %v819_v19 }
  0x33   :  { %764 = vmatprep.mubr.bf16.mxu0 %v820_v20  ;;  %780 = vmatprep.mubr.bf16.mxu1 %v821_v21 }
  0x3a   :  { %765 = vmatmul.mubr.bf16.gmra.mxu0 %v822_v22  ;;  %781 = vmatmul.mubr.bf16.gmra.mxu1 %v823_v23 }
  0xe2   :  { %v754_v24 = vpop.f32.mrf.mxu0  ;;  %v770_v25 = vpop.f32.mrf.mxu1 }
  0xe4   :  { %v238_v26 = vpop.f32.mrf.mxu0  ;;  %v302_v27 = vpop.f32.mrf.mxu1 }
  0xe6   :  { %v755_v28 = vpop.f32.mrf.mxu0  ;;  %v771_v29 = vpop.f32.mrf.mxu1 }
  0xe7   :  { %v625_v30 = vpack.c.bf16 %v755_v28, %v754_v24  ;;  %v665_v31 = vpack.c.bf16 %v771_v29, %v770_v25 }
  0xe8   :  { %v241_v32 = vpop.f32.mrf.mxu0  ;;  %v305_v33 = vpop.f32.mrf.mxu1 }
  0xe9   :  { %697 = vst [vmem:[%s961_s2 + $0x8] sm:$0xff] %v625_v30   ;;  %705 = vst [vmem:[%s961_s2 + $0x48] sm:$0xff] %v665_v31   ;;  %v620_v34 = vpack.c.bf16 %v241_v32, %v238_v26  ;;  %v660_v35 = vpack.c.bf16 %v305_v33, %v302_v27 }
  0xea   :  { %v758_v36 = vpop.f32.mrf.mxu0  ;;  %v774_v37 = vpop.f32.mrf.mxu1 }
  0xeb   :  { %621 = vst [vmem:[%s961_s2] sm:$0xff] %v620_v34   ;;  %704 = vst [vmem:[%s961_s2 + $0x40] sm:$0xff] %v660_v35  }
  0xec   :  { %v254_v38 = vpop.f32.mrf.mxu0  ;;  %v318_v39 = vpop.f32.mrf.mxu1 }
  0xee   :  { %v759_v40 = vpop.f32.mrf.mxu0  ;;  %v775_v41 = vpop.f32.mrf.mxu1 }
  0xef   :  { %v635_v42 = vpack.c.bf16 %v759_v40, %v758_v36  ;;  %v675_v43 = vpack.c.bf16 %v775_v41, %v774_v37 }
  0xf0   :  { %v257_v44 = vpop.f32.mrf.mxu0  ;;  %v321_v45 = vpop.f32.mrf.mxu1 }
  0xf1   :  { %699 = vst [vmem:[%s961_s2 + $0x18] sm:$0xff] %v635_v42   ;;  %707 = vst [vmem:[%s961_s2 + $0x58] sm:$0xff] %v675_v43   ;;  %v630_v46 = vpack.c.bf16 %v257_v44, %v254_v38  ;;  %v670_v47 = vpack.c.bf16 %v321_v45, %v318_v39 }
  0xf2   :  { %v762_v48 = vpop.f32.mrf.mxu0  ;;  %v778_v49 = vpop.f32.mrf.mxu1 }
  0xf3   :  { %698 = vst [vmem:[%s961_s2 + $0x10] sm:$0xff] %v630_v46   ;;  %706 = vst [vmem:[%s961_s2 + $0x50] sm:$0xff] %v670_v47  }
  0xf4   :  { %v270_v50 = vpop.f32.mrf.mxu0  ;;  %v334_v51 = vpop.f32.mrf.mxu1 }
  0xf6   :  { %v763_v52 = vpop.f32.mrf.mxu0  ;;  %v779_v53 = vpop.f32.mrf.mxu1 }
  0xf7   :  { %v645_v54 = vpack.c.bf16 %v763_v52, %v762_v48  ;;  %v685_v55 = vpack.c.bf16 %v779_v53, %v778_v49 }
  0xf8   :  { %v273_v56 = vpop.f32.mrf.mxu0  ;;  %v337_v57 = vpop.f32.mrf.mxu1 }
  0xf9   :  { %701 = vst [vmem:[%s961_s2 + $0x28] sm:$0xff] %v645_v54   ;;  %709 = vst [vmem:[%s961_s2 + $0x68] sm:$0xff] %v685_v55   ;;  %v640_v58 = vpack.c.bf16 %v273_v56, %v270_v50  ;;  %v680_v59 = vpack.c.bf16 %v337_v57, %v334_v51 }
  0xfa   :  { %v766_v60 = vpop.f32.mrf.mxu0  ;;  %v782_v61 = vpop.f32.mrf.mxu1 }
  0xfb   :  { %700 = vst [vmem:[%s961_s2 + $0x20] sm:$0xff] %v640_v58   ;;  %708 = vst [vmem:[%s961_s2 + $0x60] sm:$0xff] %v680_v59  }
  0xfc   :  { %v286_v62 = vpop.f32.mrf.mxu0  ;;  %v350_v63 = vpop.f32.mrf.mxu1 }
  0xfe   :  { %v767_v0 = vpop.f32.mrf.mxu0  ;;  %v783_v1 = vpop.f32.mrf.mxu1 }
  0xff   :  { %v655_v2 = vpack.c.bf16 %v767_v0, %v766_v60  ;;  %v695_v3 = vpack.c.bf16 %v783_v1, %v782_v61 }
 0x100   :  { %v289_v4 = vpop.f32.mrf.mxu0  ;;  %v353_v5 = vpop.f32.mrf.mxu1 }
 0x101   :  { %703 = vst [vmem:[%s961_s2 + $0x38] sm:$0xff] %v655_v2   ;;  %711 = vst [vmem:[%s961_s2 + $0x78] sm:$0xff] %v695_v3   ;;  %v650_v6 = vpack.c.bf16 %v289_v4, %v286_v62  ;;  %v690_v7 = vpack.c.bf16 %v353_v5, %v350_v63 }
 0x103   :  { %702 = vst [vmem:[%s961_s2 + $0x30] sm:$0xff] %v650_v6   ;;  %710 = vst [vmem:[%s961_s2 + $0x70] sm:$0xff] %v690_v7  }

// kernel: gpn_encoder.5
= control target key start
LH: loop header
LB: loop body
LE: loop exit
PB: predicated region body
PF: predicated region fallthrough
CT: control target
= control target key end

     0   :  { %s1251_s1 = inlined_call_operand.vmem [shape: bf16[256,128], index: 1, kind: input, shape index: {}]   ;;  %s1252_s0 = inlined_call_operand.vmem [shape: bf16[256,256], index: 0, kind: input, shape index: {}]   ;;  %s1253_s2 = inlined_call_operand.vmem [shape: f32[1,128], index: 2, kind: input, shape index: {}]   ;;  %s1254_s3 = inlined_call_operand.vmem [shape: f32[256,128], index: 3, kind: output, shape index: {}]  }
   0x1   :  { %v890_v0 = vld [vmem:[%s1251_s1 + $0x78] sm:$0xff]   ;;  %v892_v2 = vld [vmem:[%s1251_s1 + $0x70] sm:$0xff]   ;;  %v894_v4 = vld [vmem:[%s1251_s1 + $0x68] sm:$0xff]  }
   0x2   :  { %v891_v1 = vld [vmem:[%s1251_s1 + $0x38] sm:$0xff]   ;;  %762 = vmatprep.subr.bf16.mxu0 %v890_v0  ;;  %874 = vmatprep.subr.bf16.mxu1 %v890_v0  ;;  %v893_v3 = vld [vmem:[%s1251_s1 + $0x30] sm:$0xff]   ;;  %v895_v5 = vld [vmem:[%s1251_s1 + $0x28] sm:$0xff]  }
   0x3   :  { %763 = vmatpush3.bf16.msra.mxu0 %v891_v1  ;;  %882 = vmatpush3.bf16.msra.mxu1 %v891_v1  ;;  %v896_v6 = vld [vmem:[%s1251_s1 + $0x60] sm:$0xff]   ;;  %v898_v8 = vld [vmem:[%s1251_s1 + $0x58] sm:$0xff]   ;;  %v900_v10 = vld [vmem:[%s1251_s1 + $0x50] sm:$0xff]  }
   0x4   :  { %764 = vmatprep.subr.bf16.mxu0 %v892_v2  ;;  %875 = vmatprep.subr.bf16.mxu1 %v892_v2  ;;  %v897_v7 = vld [vmem:[%s1251_s1 + $0x20] sm:$0xff]   ;;  %v899_v9 = vld [vmem:[%s1251_s1 + $0x18] sm:$0xff]   ;;  %v901_v13 = vld [vmem:[%s1251_s1 + $0x10] sm:$0xff]  }
   0x5   :  { %v908_v11 = vld [vmem:[%s1252_s0 + $0x4] ss:$8 sps:$4 sm:$0xff]   ;;  %v906_v18 = vld [vmem:[%s1252_s0] ss:$8 sps:$4 sm:$0xff]   ;;  %v912_v20 = vld [vmem:[%s1252_s0 + $0x14] ss:$8 sps:$4 sm:$0xff]  }
   0x6   :  { %v911_v12 = vld [vmem:[%s1252_s0 + $0x84] ss:$8 sps:$4 sm:$0xff]   ;;  %447 = vmatprep.mubr.bf16.mxu0 %v908_v11  ;;  %v909_v19 = vld [vmem:[%s1252_s0 + $0x80] ss:$8 sps:$4 sm:$0xff]   ;;  %v914_v21 = vld [vmem:[%s1252_s0 + $0x94] ss:$8 sps:$4 sm:$0xff]  }
   0x7   :  { %765 = vmatpush3.bf16.msra.mxu0 %v893_v3  ;;  %883 = vmatpush3.bf16.msra.mxu1 %v893_v3  ;;  %v902_v14 = vld [vmem:[%s1251_s1 + $0x48] sm:$0xff]   ;;  %v904_v16 = vld [vmem:[%s1251_s1 + $0x40] sm:$0xff]   ;;  %v916_v22 = vld [vmem:[%s1252_s0 + $0x10] ss:$8 sps:$4 sm:$0xff]  }
   0x8   :  { %766 = vmatprep.subr.bf16.mxu0 %v894_v4  ;;  %876 = vmatprep.subr.bf16.mxu1 %v894_v4  ;;  %v903_v15 = vld [vmem:[%s1251_s1 + $0x8] sm:$0xff]   ;;  %v905_v17 = vld [vmem:[%s1251_s1] sm:$0xff]   ;;  %v917_v23 = vld [vmem:[%s1252_s0 + $0x90] ss:$8 sps:$4 sm:$0xff]  }
   0x9   :  { %511 = vmatprep.mubr.bf16.mxu1 %v911_v12  ;;  %v918_v24 = vld [vmem:[%s1252_s0 + $0x24] ss:$8 sps:$4 sm:$0xff]   ;;  %v922_v26 = vld [vmem:[%s1252_s0 + $0x20] ss:$8 sps:$4 sm:$0xff]   ;;  %v924_v28 = vld [vmem:[%s1252_s0 + $0x34] ss:$8 sps:$4 sm:$0xff]  }
   0xa   :  { %v920_v25 = vld [vmem:[%s1252_s0 + $0xa4] ss:$8 sps:$4 sm:$0xff]   ;;  %v923_v27 = vld [vmem:[%s1252_s0 + $0xa0] ss:$8 sps:$4 sm:$0xff]   ;;  %v926_v29 = vld [vmem:[%s1252_s0 + $0xb4] ss:$8 sps:$4 sm:$0xff]  }
   0xb   :  { %767 = vmatpush3.bf16.msra.mxu0 %v895_v5  ;;  %884 = vmatpush3.bf16.msra.mxu1 %v895_v5  ;;  %v928_v30 = vld [vmem:[%s1252_s0 + $0x30] ss:$8 sps:$4 sm:$0xff]   ;;  %v930_v32 = vld [vmem:[%s1252_s0 + $0x44] ss:$8 sps:$4 sm:$0xff]   ;;  %v934_v34 = vld [vmem:[%s1252_s0 + $0x40] ss:$8 sps:$4 sm:$0xff]  }
   0xc   :  { %768 = vmatprep.subr.bf16.mxu0 %v896_v6  ;;  %877 = vmatprep.subr.bf16.mxu1 %v896_v6  ;;  %v929_v31 = vld [vmem:[%s1252_s0 + $0xb0] ss:$8 sps:$4 sm:$0xff]   ;;  %v932_v33 = vld [vmem:[%s1252_s0 + $0xc4] ss:$8 sps:$4 sm:$0xff]   ;;  %v935_v35 = vld [vmem:[%s1252_s0 + $0xc0] ss:$8 sps:$4 sm:$0xff]  }
   0xd   :  { %v936_v36 = vld [vmem:[%s1252_s0 + $0x54] ss:$8 sps:$4 sm:$0xff]   ;;  %v940_v38 = vld [vmem:[%s1252_s0 + $0x50] ss:$8 sps:$4 sm:$0xff]   ;;  %v942_v40 = vld [vmem:[%s1252_s0 + $0x64] ss:$8 sps:$4 sm:$0xff]  }
   0xe   :  { %v938_v37 = vld [vmem:[%s1252_s0 + $0xd4] ss:$8 sps:$4 sm:$0xff]   ;;  %v941_v39 = vld [vmem:[%s1252_s0 + $0xd0] ss:$8 sps:$4 sm:$0xff]   ;;  %v944_v41 = vld [vmem:[%s1252_s0 + $0xe4] ss:$8 sps:$4 sm:$0xff]  }
   0xf   :  { %769 = vmatpush3.bf16.msra.mxu0 %v897_v7  ;;  %885 = vmatpush3.bf16.msra.mxu1 %v897_v7  ;;  %v946_v42 = vld [vmem:[%s1252_s0 + $0x60] ss:$8 sps:$4 sm:$0xff]   ;;  %v948_v44 = vld [vmem:[%s1252_s0 + $0x74] ss:$8 sps:$4 sm:$0xff]   ;;  %v952_v46 = vld [vmem:[%s1252_s0 + $0x70] ss:$8 sps:$4 sm:$0xff]  }
  0x10   :  { %770 = vmatprep.subr.bf16.mxu0 %v898_v8  ;;  %878 = vmatprep.subr.bf16.mxu1 %v898_v8  ;;  %v947_v43 = vld [vmem:[%s1252_s0 + $0xe0] ss:$8 sps:$4 sm:$0xff]   ;;  %v950_v45 = vld [vmem:[%s1252_s0 + $0xf4] ss:$8 sps:$4 sm:$0xff]   ;;  %v953_v47 = vld [vmem:[%s1252_s0 + $0xf0] ss:$8 sps:$4 sm:$0xff]  }
  0x11   :  { %v1121_v50 = vld [vmem:[%s1253_s2] ss:$0 sm:$0xff] }
  0x13   :  { %771 = vmatpush3.bf16.msra.mxu0 %v899_v9  ;;  %886 = vmatpush3.bf16.msra.mxu1 %v899_v9 }
  0x14   :  { %772 = vmatprep.subr.bf16.mxu0 %v900_v10  ;;  %879 = vmatprep.subr.bf16.mxu1 %v900_v10 }
  0x17   :  { %773 = vmatpush3.bf16.msra.mxu0 %v901_v13  ;;  %887 = vmatpush3.bf16.msra.mxu1 %v901_v13 }
  0x18   :  { %774 = vmatprep.subr.bf16.mxu0 %v902_v14  ;;  %880 = vmatprep.subr.bf16.mxu1 %v902_v14 }
  0x1b   :  { %775 = vmatpush3.bf16.msra.mxu0 %v903_v15  ;;  %888 = vmatpush3.bf16.msra.mxu1 %v903_v15 }
  0x1c   :  { %776 = vmatprep.subr.bf16.mxu0 %v904_v16  ;;  %881 = vmatprep.subr.bf16.mxu1 %v904_v16 }
  0x1f   :  { %777 = vmatpush3.bf16.msra.mxu0 %v905_v17  ;;  %889 = vmatpush3.bf16.msra.mxu1 %v905_v17 }
  0x22   :  { %448 = vmatmul.mubr.bf16.vlgmr.msra.gmra.mxu0 %v906_v18  ;;  %512 = vmatmul.mubr.bf16.vlgmr.msra.gmra.mxu1 %v909_v19 }
  0x23   :  { %455 = vmatprep.mubr.bf16.mxu0 %v912_v20  ;;  %519 = vmatprep.mubr.bf16.mxu1 %v914_v21 }
  0x2a   :  { %456 = vmatmul.mubr.bf16.gmra.mxu0 %v916_v22  ;;  %520 = vmatmul.mubr.bf16.gmra.mxu1 %v917_v23 }
  0x2b   :  { %463 = vmatprep.mubr.bf16.mxu0 %v918_v24  ;;  %527 = vmatprep.mubr.bf16.mxu1 %v920_v25 }
  0x32   :  { %464 = vmatmul.mubr.bf16.gmra.mxu0 %v922_v26  ;;  %528 = vmatmul.mubr.bf16.gmra.mxu1 %v923_v27 }
  0x33   :  { %471 = vmatprep.mubr.bf16.mxu0 %v924_v28  ;;  %535 = vmatprep.mubr.bf16.mxu1 %v926_v29 }
  0x3a   :  { %472 = vmatmul.mubr.bf16.gmra.mxu0 %v928_v30  ;;  %536 = vmatmul.mubr.bf16.gmra.mxu1 %v929_v31 }
  0x3b   :  { %479 = vmatprep.mubr.bf16.mxu0 %v930_v32  ;;  %543 = vmatprep.mubr.bf16.mxu1 %v932_v33 }
  0x42   :  { %480 = vmatmul.mubr.bf16.gmra.mxu0 %v934_v34  ;;  %544 = vmatmul.mubr.bf16.gmra.mxu1 %v935_v35 }
  0x43   :  { %487 = vmatprep.mubr.bf16.mxu0 %v936_v36  ;;  %551 = vmatprep.mubr.bf16.mxu1 %v938_v37 }
  0x4a   :  { %488 = vmatmul.mubr.bf16.gmra.mxu0 %v940_v38  ;;  %552 = vmatmul.mubr.bf16.gmra.mxu1 %v941_v39 }
  0x4b   :  { %495 = vmatprep.mubr.bf16.mxu0 %v942_v40  ;;  %559 = vmatprep.mubr.bf16.mxu1 %v944_v41 }
  0x52   :  { %496 = vmatmul.mubr.bf16.gmra.mxu0 %v946_v42  ;;  %560 = vmatmul.mubr.bf16.gmra.mxu1 %v947_v43 }
  0x53   :  { %503 = vmatprep.mubr.bf16.mxu0 %v948_v44  ;;  %567 = vmatprep.mubr.bf16.mxu1 %v950_v45 }
  0x5a   :  { %504 = vmatmul.mubr.bf16.gmra.mxu0 %v952_v46  ;;  %568 = vmatmul.mubr.bf16.gmra.mxu1 %v953_v47 }
  0xe2   :  { %v778_v48 = vpop.f32.mrf.mxu0  ;;  %v826_v49 = vpop.f32.mrf.mxu1 }
  0xe4   :  { %v779_v51 = vpop.f32.mrf.mxu0  ;;  %v827_v52 = vpop.f32.mrf.mxu1 }
  0xe5   :  { %v780_v53 = vadd.f32 %v779_v51, %v778_v48  ;;  %v828_v54 = vadd.f32 %v827_v52, %v826_v49 }
  0xe6   :  { %v781_v55 = vpop.f32.mrf.mxu0  ;;  %v829_v56 = vpop.f32.mrf.mxu1 }
  0xe7   :  { %v576_v57 = vadd.f32 %v780_v53, %v1121_v50  ;;  %v592_v58 = vadd.f32 %v828_v54, %v1121_v50 }
  0xe8   :  { %v782_v59 = vpop.f32.mrf.mxu0  ;;  %v830_v60 = vpop.f32.mrf.mxu1 }
  0xe9   :  { %675 = vst [vmem:[%s1254_s3] sm:$0xff] %v576_v57  ;;  %691 = vst [vmem:[%s1254_s3 + $0x80] sm:$0xff] %v592_v58  ;;  %v783_v61 = vadd.f32 %v782_v59, %v781_v55  ;;  %v831_v62 = vadd.f32 %v830_v60, %v829_v56 }
  0xea   :  { %v784_v63 = vpop.f32.mrf.mxu0  ;;  %v832_v0 = vpop.f32.mrf.mxu1 }
  0xeb   :  { %v577_v1 = vadd.f32 %v783_v61, %v1121_v50  ;;  %v593_v2 = vadd.f32 %v831_v62, %v1121_v50 }
  0xec   :  { %v785_v3 = vpop.f32.mrf.mxu0  ;;  %v833_v4 = vpop.f32.mrf.mxu1 }
  0xed   :  { %676 = vst [vmem:[%s1254_s3 + $0x8] sm:$0xff] %v577_v1  ;;  %692 = vst [vmem:[%s1254_s3 + $0x88] sm:$0xff] %v593_v2  ;;  %v786_v5 = vadd.f32 %v785_v3, %v784_v63  ;;  %v834_v6 = vadd.f32 %v833_v4, %v832_v0 }
  0xee   :  { %v787_v7 = vpop.f32.mrf.mxu0  ;;  %v835_v8 = vpop.f32.mrf.mxu1 }
  0xef   :  { %v578_v9 = vadd.f32 %v786_v5, %v1121_v50  ;;  %v594_v10 = vadd.f32 %v834_v6, %v1121_v50 }
  0xf0   :  { %v788_v11 = vpop.f32.mrf.mxu0  ;;  %v836_v12 = vpop.f32.mrf.mxu1 }
  0xf1   :  { %677 = vst [vmem:[%s1254_s3 + $0x10] sm:$0xff] %v578_v9  ;;  %693 = vst [vmem:[%s1254_s3 + $0x90] sm:$0xff] %v594_v10  ;;  %v789_v13 = vadd.f32 %v788_v11, %v787_v7  ;;  %v837_v14 = vadd.f32 %v836_v12, %v835_v8 }
  0xf2   :  { %v790_v15 = vpop.f32.mrf.mxu0  ;;  %v838_v16 = vpop.f32.mrf.mxu1 }
  0xf3   :  { %v579_v17 = vadd.f32 %v789_v13, %v1121_v50  ;;  %v595_v18 = vadd.f32 %v837_v14, %v1121_v50 }
  0xf4   :  { %v791_v19 = vpop.f32.mrf.mxu0  ;;  %v839_v20 = vpop.f32.mrf.mxu1 }
  0xf5   :  { %678 = vst [vmem:[%s1254_s3 + $0x18] sm:$0xff] %v579_v17  ;;  %694 = vst [vmem:[%s1254_s3 + $0x98] sm:$0xff] %v595_v18  ;;  %v792_v21 = vadd.f32 %v791_v19, %v790_v15  ;;  %v840_v22 = vadd.f32 %v839_v20, %v838_v16 }
  0xf6   :  { %v793_v23 = vpop.f32.mrf.mxu0  ;;  %v841_v24 = vpop.f32.mrf.mxu1 }
  0xf7   :  { %v580_v25 = vadd.f32 %v792_v21, %v1121_v50  ;;  %v596_v26 = vadd.f32 %v840_v22, %v1121_v50 }
  0xf8   :  { %v794_v27 = vpop.f32.mrf.mxu0  ;;  %v842_v28 = vpop.f32.mrf.mxu1 }
  0xf9   :  { %679 = vst [vmem:[%s1254_s3 + $0x20] sm:$0xff] %v580_v25  ;;  %695 = vst [vmem:[%s1254_s3 + $0xa0] sm:$0xff] %v596_v26  ;;  %v795_v29 = vadd.f32 %v794_v27, %v793_v23  ;;  %v843_v30 = vadd.f32 %v842_v28, %v841_v24 }
  0xfa   :  { %v796_v31 = vpop.f32.mrf.mxu0  ;;  %v844_v32 = vpop.f32.mrf.mxu1 }
  0xfb   :  { %v581_v33 = vadd.f32 %v795_v29, %v1121_v50  ;;  %v597_v34 = vadd.f32 %v843_v30, %v1121_v50 }
  0xfc   :  { %v797_v35 = vpop.f32.mrf.mxu0  ;;  %v845_v36 = vpop.f32.mrf.mxu1 }
  0xfd   :  { %680 = vst [vmem:[%s1254_s3 + $0x28] sm:$0xff] %v581_v33  ;;  %696 = vst [vmem:[%s1254_s3 + $0xa8] sm:$0xff] %v597_v34  ;;  %v798_v37 = vadd.f32 %v797_v35, %v796_v31  ;;  %v846_v38 = vadd.f32 %v845_v36, %v844_v32 }
  0xfe   :  { %v799_v39 = vpop.f32.mrf.mxu0  ;;  %v847_v40 = vpop.f32.mrf.mxu1 }
  0xff   :  { %v582_v41 = vadd.f32 %v798_v37, %v1121_v50  ;;  %v598_v42 = vadd.f32 %v846_v38, %v1121_v50 }
 0x100   :  { %v800_v43 = vpop.f32.mrf.mxu0  ;;  %v848_v44 = vpop.f32.mrf.mxu1 }
 0x101   :  { %681 = vst [vmem:[%s1254_s3 + $0x30] sm:$0xff] %v582_v41  ;;  %697 = vst [vmem:[%s1254_s3 + $0xb0] sm:$0xff] %v598_v42  ;;  %v801_v45 = vadd.f32 %v800_v43, %v799_v39  ;;  %v849_v46 = vadd.f32 %v848_v44, %v847_v40 }
 0x102   :  { %v802_v47 = vpop.f32.mrf.mxu0  ;;  %v850_v48 = vpop.f32.mrf.mxu1 }
 0x103   :  { %v583_v49 = vadd.f32 %v801_v45, %v1121_v50  ;;  %v599_v51 = vadd.f32 %v849_v46, %v1121_v50 }
 0x104   :  { %v803_v52 = vpop.f32.mrf.mxu0  ;;  %v851_v53 = vpop.f32.mrf.mxu1 }
 0x105   :  { %682 = vst [vmem:[%s1254_s3 + $0x38] sm:$0xff] %v583_v49  ;;  %698 = vst [vmem:[%s1254_s3 + $0xb8] sm:$0xff] %v599_v51  ;;  %v804_v54 = vadd.f32 %v803_v52, %v802_v47  ;;  %v852_v55 = vadd.f32 %v851_v53, %v850_v48 }
 0x106   :  { %v805_v56 = vpop.f32.mrf.mxu0  ;;  %v853_v57 = vpop.f32.mrf.mxu1 }
 0x107   :  { %v584_v58 = vadd.f32 %v804_v54, %v1121_v50  ;;  %v600_v59 = vadd.f32 %v852_v55, %v1121_v50 }
 0x108   :  { %v806_v60 = vpop.f32.mrf.mxu0  ;;  %v854_v61 = vpop.f32.mrf.mxu1 }
 0x109   :  { %683 = vst [vmem:[%s1254_s3 + $0x40] sm:$0xff] %v584_v58  ;;  %699 = vst [vmem:[%s1254_s3 + $0xc0] sm:$0xff] %v600_v59  ;;  %v807_v62 = vadd.f32 %v806_v60, %v805_v56  ;;  %v855_v63 = vadd.f32 %v854_v61, %v853_v57 }
 0x10a   :  { %v808_v0 = vpop.f32.mrf.mxu0  ;;  %v856_v1 = vpop.f32.mrf.mxu1 }
 0x10b   :  { %v585_v2 = vadd.f32 %v807_v62, %v1121_v50  ;;  %v601_v3 = vadd.f32 %v855_v63, %v1121_v50 }
 0x10c   :  { %v809_v4 = vpop.f32.mrf.mxu0  ;;  %v857_v5 = vpop.f32.mrf.mxu1 }
 0x10d   :  { %684 = vst [vmem:[%s1254_s3 + $0x48] sm:$0xff] %v585_v2  ;;  %700 = vst [vmem:[%s1254_s3 + $0xc8] sm:$0xff] %v601_v3  ;;  %v810_v6 = vadd.f32 %v809_v4, %v808_v0  ;;  %v858_v7 = vadd.f32 %v857_v5, %v856_v1 }
 0x10e   :  { %v811_v8 = vpop.f32.mrf.mxu0  ;;  %v859_v9 = vpop.f32.mrf.mxu1 }
 0x10f   :  { %v586_v10 = vadd.f32 %v810_v6, %v1121_v50  ;;  %v602_v11 = vadd.f32 %v858_v7, %v1121_v50 }
 0x110   :  { %v812_v12 = vpop.f32.mrf.mxu0  ;;  %v860_v13 = vpop.f32.mrf.mxu1 }
 0x111   :  { %685 = vst [vmem:[%s1254_s3 + $0x50] sm:$0xff] %v586_v10  ;;  %701 = vst [vmem:[%s1254_s3 + $0xd0] sm:$0xff] %v602_v11  ;;  %v813_v14 = vadd.f32 %v812_v12, %v811_v8  ;;  %v861_v15 = vadd.f32 %v860_v13, %v859_v9 }
 0x112   :  { %v814_v16 = vpop.f32.mrf.mxu0  ;;  %v862_v17 = vpop.f32.mrf.mxu1 }
 0x113   :  { %v587_v18 = vadd.f32 %v813_v14, %v1121_v50  ;;  %v603_v19 = vadd.f32 %v861_v15, %v1121_v50 }
 0x114   :  { %v815_v20 = vpop.f32.mrf.mxu0  ;;  %v863_v21 = vpop.f32.mrf.mxu1 }
 0x115   :  { %686 = vst [vmem:[%s1254_s3 + $0x58] sm:$0xff] %v587_v18  ;;  %702 = vst [vmem:[%s1254_s3 + $0xd8] sm:$0xff] %v603_v19  ;;  %v816_v22 = vadd.f32 %v815_v20, %v814_v16  ;;  %v864_v23 = vadd.f32 %v863_v21, %v862_v17 }
 0x116   :  { %v817_v24 = vpop.f32.mrf.mxu0  ;;  %v865_v25 = vpop.f32.mrf.mxu1 }
 0x117   :  { %v588_v26 = vadd.f32 %v816_v22, %v1121_v50  ;;  %v604_v27 = vadd.f32 %v864_v23, %v1121_v50 }
 0x118   :  { %v818_v28 = vpop.f32.mrf.mxu0  ;;  %v866_v29 = vpop.f32.mrf.mxu1 }
 0x119   :  { %687 = vst [vmem:[%s1254_s3 + $0x60] sm:$0xff] %v588_v26  ;;  %703 = vst [vmem:[%s1254_s3 + $0xe0] sm:$0xff] %v604_v27  ;;  %v819_v30 = vadd.f32 %v818_v28, %v817_v24  ;;  %v867_v31 = vadd.f32 %v866_v29, %v865_v25 }
 0x11a   :  { %v820_v32 = vpop.f32.mrf.mxu0  ;;  %v868_v33 = vpop.f32.mrf.mxu1 }
 0x11b   :  { %v589_v34 = vadd.f32 %v819_v30, %v1121_v50  ;;  %v605_v35 = vadd.f32 %v867_v31, %v1121_v50 }
 0x11c   :  { %v821_v36 = vpop.f32.mrf.mxu0  ;;  %v869_v37 = vpop.f32.mrf.mxu1 }
 0x11d   :  { %688 = vst [vmem:[%s1254_s3 + $0x68] sm:$0xff] %v589_v34  ;;  %704 = vst [vmem:[%s1254_s3 + $0xe8] sm:$0xff] %v605_v35  ;;  %v822_v38 = vadd.f32 %v821_v36, %v820_v32  ;;  %v870_v39 = vadd.f32 %v869_v37, %v868_v33 }
 0x11e   :  { %v823_v40 = vpop.f32.mrf.mxu0  ;;  %v871_v41 = vpop.f32.mrf.mxu1 }
 0x11f   :  { %v590_v42 = vadd.f32 %v822_v38, %v1121_v50  ;;  %v606_v43 = vadd.f32 %v870_v39, %v1121_v50 }
 0x120   :  { %v824_v44 = vpop.f32.mrf.mxu0  ;;  %v872_v45 = vpop.f32.mrf.mxu1 }
 0x121   :  { %689 = vst [vmem:[%s1254_s3 + $0x70] sm:$0xff] %v590_v42  ;;  %705 = vst [vmem:[%s1254_s3 + $0xf0] sm:$0xff] %v606_v43  ;;  %v825_v46 = vadd.f32 %v824_v44, %v823_v40  ;;  %v873_v47 = vadd.f32 %v872_v45, %v871_v41 }
 0x123   :  { %v591_v48 = vadd.f32 %v825_v46, %v1121_v50  ;;  %v607_v49 = vadd.f32 %v873_v47, %v1121_v50 }
 0x125   :  { %690 = vst [vmem:[%s1254_s3 + $0x78] sm:$0xff] %v591_v48  ;;  %706 = vst [vmem:[%s1254_s3 + $0xf8] sm:$0xff] %v607_v49 }

// kernel: gpn_encoder.4
= control target key start
LH: loop header
LB: loop body
LE: loop exit
PB: predicated region body
PF: predicated region fallthrough
CT: control target
= control target key end

     0   :  { %s1901_s1 = inlined_call_operand.vmem [shape: bf16[256,128], index: 1, kind: input, shape index: {}]   ;;  %s1902_s0 = inlined_call_operand.vmem [shape: bf16[256,256], index: 0, kind: input, shape index: {}]   ;;  %s1903_s3 = inlined_call_operand.vmem [shape: bf16[128,128], index: 3, kind: input, shape index: {}]   ;;  %s1904_s2 = inlined_call_operand.vmem [shape: f32[1,128], index: 2, kind: input, shape index: {}]   ;;  %s1905_s4 = inlined_call_operand.vmem [shape: bf16[256,128], index: 4, kind: output, shape index: {}]  }
   0x1   :  { %v1533_v0 = vld [vmem:[%s1901_s1 + $0x78] sm:$0xff]   ;;  %v1535_v2 = vld [vmem:[%s1901_s1 + $0x70] sm:$0xff]   ;;  %v1537_v4 = vld [vmem:[%s1901_s1 + $0x68] sm:$0xff]  }
   0x2   :  { %v1534_v1 = vld [vmem:[%s1901_s1 + $0x38] sm:$0xff]   ;;  %1333 = vmatprep.subr.bf16.mxu0 %v1533_v0  ;;  %1517 = vmatprep.subr.bf16.mxu1 %v1533_v0  ;;  %v1536_v3 = vld [vmem:[%s1901_s1 + $0x30] sm:$0xff]   ;;  %v1538_v5 = vld [vmem:[%s1901_s1 + $0x28] sm:$0xff]  }
   0x3   :  { %1334 = vmatpush3.bf16.msra.mxu0 %v1534_v1  ;;  %1525 = vmatpush3.bf16.msra.mxu1 %v1534_v1  ;;  %v1539_v6 = vld [vmem:[%s1901_s1 + $0x60] sm:$0xff]   ;;  %v1541_v8 = vld [vmem:[%s1901_s1 + $0x58] sm:$0xff]   ;;  %v1543_v10 = vld [vmem:[%s1901_s1 + $0x50] sm:$0xff]  }
   0x4   :  { %1335 = vmatprep.subr.bf16.mxu0 %v1535_v2  ;;  %1518 = vmatprep.subr.bf16.mxu1 %v1535_v2  ;;  %v1540_v7 = vld [vmem:[%s1901_s1 + $0x20] sm:$0xff]   ;;  %v1542_v9 = vld [vmem:[%s1901_s1 + $0x18] sm:$0xff]   ;;  %v1544_v12 = vld [vmem:[%s1901_s1 + $0x10] sm:$0xff]  }
   0x5   :  { %v1551_v11 = vld [vmem:[%s1902_s0 + $0x4] ss:$8 sps:$4 sm:$0xff]   ;;  %v1549_v17 = vld [vmem:[%s1902_s0] ss:$8 sps:$4 sm:$0xff]   ;;  %v1552_v19 = vld [vmem:[%s1902_s0 + $0x14] ss:$8 sps:$4 sm:$0xff]  }
   0x6   :  { %450 = vmatprep.mubr.bf16.mxu0 %v1551_v11  ;;  %v1545_v13 = vld [vmem:[%s1901_s1 + $0x48] sm:$0xff]   ;;  %v1547_v15 = vld [vmem:[%s1901_s1 + $0x40] sm:$0xff]   ;;  %v1585_v21 = vld [vmem:[%s1902_s0 + $0xd4] ss:$8 sps:$4 sm:$0xff]  }
   0x7   :  { %1336 = vmatpush3.bf16.msra.mxu0 %v1536_v3  ;;  %1526 = vmatpush3.bf16.msra.mxu1 %v1536_v3  ;;  %v1546_v14 = vld [vmem:[%s1901_s1 + $0x8] sm:$0xff]   ;;  %v1548_v16 = vld [vmem:[%s1901_s1] sm:$0xff]   ;;  %v1554_v22 = vld [vmem:[%s1902_s0 + $0x10] ss:$8 sps:$4 sm:$0xff]  }
   0x8   :  { %1337 = vmatprep.subr.bf16.mxu0 %v1537_v4  ;;  %1519 = vmatprep.subr.bf16.mxu1 %v1537_v4  ;;  %v1581_v18 = vld [vmem:[%s1902_s0 + $0xc4] ss:$8 sps:$4 sm:$0xff]   ;;  %v1579_v20 = vld [vmem:[%s1902_s0 + $0xc0] ss:$8 sps:$4 sm:$0xff]   ;;  %v1587_v24 = vld [vmem:[%s1902_s0 + $0xd0] ss:$8 sps:$4 sm:$0xff]  }
   0x9   :  { %546 = vmatprep.mubr.bf16.mxu1 %v1581_v18  ;;  %v1555_v23 = vld [vmem:[%s1902_s0 + $0x24] ss:$8 sps:$4 sm:$0xff]   ;;  %v1597_v26 = vld [vmem:[%s1903_s3 + $0x38] sm:$0xff]   ;;  %v1598_v27 = vld [vmem:[%s1903_s3 + $0x30] sm:$0xff]  }
   0xa   :  { %v1591_v25 = vld [vmem:[%s1902_s0 + $0xe4] ss:$8 sps:$4 sm:$0xff]   ;;  %v1557_v29 = vld [vmem:[%s1902_s0 + $0x20] ss:$8 sps:$4 sm:$0xff]   ;;  %v1558_v30 = vld [vmem:[%s1902_s0 + $0x34] ss:$8 sps:$4 sm:$0xff]  }
   0xb   :  { %1338 = vmatpush3.bf16.msra.mxu0 %v1538_v5  ;;  %1527 = vmatpush3.bf16.msra.mxu1 %v1538_v5  ;;  %v1599_v28 = vld [vmem:[%s1903_s3 + $0x28] sm:$0xff]   ;;  %v1594_v32 = vld [vmem:[%s1902_s0 + $0xf4] ss:$8 sps:$4 sm:$0xff]   ;;  %v1560_v33 = vld [vmem:[%s1902_s0 + $0x30] ss:$8 sps:$4 sm:$0xff]  }
   0xc   :  { %1339 = vmatprep.subr.bf16.mxu0 %v1539_v6  ;;  %1520 = vmatprep.subr.bf16.mxu1 %v1539_v6  ;;  %v1593_v31 = vld [vmem:[%s1902_s0 + $0xe0] ss:$8 sps:$4 sm:$0xff]   ;;  %v1561_v34 = vld [vmem:[%s1902_s0 + $0x44] ss:$8 sps:$4 sm:$0xff]   ;;  %v1596_v35 = vld [vmem:[%s1902_s0 + $0xf0] ss:$8 sps:$4 sm:$0xff]  }
   0xd   :  { %v1563_v36 = vld [vmem:[%s1902_s0 + $0x40] ss:$8 sps:$4 sm:$0xff]   ;;  %v1564_v37 = vld [vmem:[%s1902_s0 + $0x54] ss:$8 sps:$4 sm:$0xff]   ;;  %v1566_v38 = vld [vmem:[%s1902_s0 + $0x50] ss:$8 sps:$4 sm:$0xff]  }
   0xe   :  { %v1567_v39 = vld [vmem:[%s1902_s0 + $0x64] ss:$8 sps:$4 sm:$0xff]   ;;  %v1569_v40 = vld [vmem:[%s1902_s0 + $0x60] ss:$8 sps:$4 sm:$0xff]   ;;  %v1570_v41 = vld [vmem:[%s1902_s0 + $0x74] ss:$8 sps:$4 sm:$0xff]  }
   0xf   :  { %1340 = vmatpush3.bf16.msra.mxu0 %v1540_v7  ;;  %1528 = vmatpush3.bf16.msra.mxu1 %v1540_v7  ;;  %v1572_v42 = vld [vmem:[%s1902_s0 + $0x70] ss:$8 sps:$4 sm:$0xff]   ;;  %v1573_v43 = vld [vmem:[%s1902_s0 + $0x84] ss:$8 sps:$4 sm:$0xff]   ;;  %v1575_v44 = vld [vmem:[%s1902_s0 + $0x80] ss:$8 sps:$4 sm:$0xff]  }
  0x10   :  { %1341 = vmatprep.subr.bf16.mxu0 %v1541_v8  ;;  %1521 = vmatprep.subr.bf16.mxu1 %v1541_v8  ;;  %v1576_v45 = vld [vmem:[%s1902_s0 + $0x94] ss:$8 sps:$4 sm:$0xff]   ;;  %v1600_v46 = vld [vmem:[%s1903_s3 + $0x20] sm:$0xff]   ;;  %v1578_v47 = vld [vmem:[%s1902_s0 + $0x90] ss:$8 sps:$4 sm:$0xff]  }
  0x11   :  { %v1582_v48 = vld [vmem:[%s1902_s0 + $0xa4] ss:$8 sps:$4 sm:$0xff]   ;;  %v1601_v49 = vld [vmem:[%s1903_s3 + $0x18] sm:$0xff]   ;;  %v1602_v50 = vld [vmem:[%s1903_s3 + $0x10] sm:$0xff]  }
  0x12   :  { %v1584_v51 = vld [vmem:[%s1902_s0 + $0xa0] ss:$8 sps:$4 sm:$0xff]   ;;  %v1588_v52 = vld [vmem:[%s1902_s0 + $0xb4] ss:$8 sps:$4 sm:$0xff]   ;;  %v1590_v55 = vld [vmem:[%s1902_s0 + $0xb0] ss:$8 sps:$4 sm:$0xff]  }
  0x13   :  { %1342 = vmatpush3.bf16.msra.mxu0 %v1542_v9  ;;  %1529 = vmatpush3.bf16.msra.mxu1 %v1542_v9  ;;  %v1603_v53 = vld [vmem:[%s1903_s3 + $0x8] sm:$0xff]   ;;  %v1604_v54 = vld [vmem:[%s1903_s3] sm:$0xff]  }
  0x14   :  { %1343 = vmatprep.subr.bf16.mxu0 %v1543_v10  ;;  %1522 = vmatprep.subr.bf16.mxu1 %v1543_v10  ;;  %v1801_v59 = vld [vmem:[%s1904_s2] ss:$0 sm:$0xff] }
  0x17   :  { %1344 = vmatpush3.bf16.msra.mxu0 %v1544_v12  ;;  %1530 = vmatpush3.bf16.msra.mxu1 %v1544_v12 }
  0x18   :  { %1345 = vmatprep.subr.bf16.mxu0 %v1545_v13  ;;  %1523 = vmatprep.subr.bf16.mxu1 %v1545_v13 }
  0x1b   :  { %1346 = vmatpush3.bf16.msra.mxu0 %v1546_v14  ;;  %1531 = vmatpush3.bf16.msra.mxu1 %v1546_v14 }
  0x1c   :  { %1347 = vmatprep.subr.bf16.mxu0 %v1547_v15  ;;  %1524 = vmatprep.subr.bf16.mxu1 %v1547_v15 }
  0x1f   :  { %1348 = vmatpush3.bf16.msra.mxu0 %v1548_v16  ;;  %1532 = vmatpush3.bf16.msra.mxu1 %v1548_v16 }
  0x20   :  { %1469 = vmatprep.subr.bf16.mxu1 %v1597_v26 }
  0x22   :  { %451 = vmatmul.mubr.bf16.vlgmr.msra.gmra.mxu0 %v1549_v17  ;;  %547 = vmatmul.mubr.bf16.vlgmr.msra.gmra.mxu1 %v1579_v20 }
  0x23   :  { %458 = vmatprep.mubr.bf16.mxu0 %v1552_v19  ;;  %554 = vmatprep.mubr.bf16.mxu1 %v1585_v21 }
  0x24   :  { %1470 = vmatpush3.bf16.msra.mxu1 %v1597_v26 }
  0x25   :  { %1471 = vmatprep.subr.bf16.mxu1 %v1598_v27 }
  0x28   :  { %1472 = vmatpush3.bf16.msra.mxu1 %v1598_v27 }
  0x29   :  { %1473 = vmatprep.subr.bf16.mxu1 %v1599_v28 }
  0x2a   :  { %459 = vmatmul.mubr.bf16.gmra.mxu0 %v1554_v22  ;;  %555 = vmatmul.mubr.bf16.gmra.mxu1 %v1587_v24 }
  0x2b   :  { %466 = vmatprep.mubr.bf16.mxu0 %v1555_v23  ;;  %562 = vmatprep.mubr.bf16.mxu1 %v1591_v25 }
  0x2c   :  { %1474 = vmatpush3.bf16.msra.mxu1 %v1599_v28 }
  0x2d   :  { %1475 = vmatprep.subr.bf16.mxu1 %v1600_v46 }
  0x30   :  { %1476 = vmatpush3.bf16.msra.mxu1 %v1600_v46 }
  0x31   :  { %1477 = vmatprep.subr.bf16.mxu1 %v1601_v49 }
  0x32   :  { %467 = vmatmul.mubr.bf16.gmra.mxu0 %v1557_v29  ;;  %563 = vmatmul.mubr.bf16.gmra.mxu1 %v1593_v31 }
  0x33   :  { %474 = vmatprep.mubr.bf16.mxu0 %v1558_v30  ;;  %570 = vmatprep.mubr.bf16.mxu1 %v1594_v32 }
  0x34   :  { %1478 = vmatpush3.bf16.msra.mxu1 %v1601_v49 }
  0x35   :  { %1479 = vmatprep.subr.bf16.mxu1 %v1602_v50 }
  0x38   :  { %1480 = vmatpush3.bf16.msra.mxu1 %v1602_v50 }
  0x39   :  { %1481 = vmatprep.subr.bf16.mxu1 %v1603_v53 }
  0x3a   :  { %475 = vmatmul.mubr.bf16.gmra.mxu0 %v1560_v33  ;;  %571 = vmatmul.mubr.bf16.gmra.mxu1 %v1596_v35 }
  0x3b   :  { %482 = vmatprep.mubr.bf16.mxu0 %v1561_v34 }
  0x3c   :  { %1482 = vmatpush3.bf16.msra.mxu1 %v1603_v53 }
  0x3d   :  { %1483 = vmatprep.subr.bf16.mxu1 %v1604_v54 }
  0x40   :  { %1484 = vmatpush3.bf16.msra.mxu1 %v1604_v54 }
  0x42   :  { %483 = vmatmul.mubr.bf16.gmra.mxu0 %v1563_v36 }
  0x43   :  { %490 = vmatprep.mubr.bf16.mxu0 %v1564_v37 }
  0x4a   :  { %491 = vmatmul.mubr.bf16.gmra.mxu0 %v1566_v38 }
  0x4b   :  { %498 = vmatprep.mubr.bf16.mxu0 %v1567_v39 }
  0x52   :  { %499 = vmatmul.mubr.bf16.gmra.mxu0 %v1569_v40 }
  0x53   :  { %506 = vmatprep.mubr.bf16.mxu0 %v1570_v41 }
  0x5a   :  { %507 = vmatmul.mubr.bf16.gmra.mxu0 %v1572_v42 }
  0x5b   :  { %514 = vmatprep.mubr.bf16.mxu0 %v1573_v43 }
  0x62   :  { %515 = vmatmul.mubr.bf16.gmra.mxu0 %v1575_v44 }
  0x63   :  { %522 = vmatprep.mubr.bf16.mxu0 %v1576_v45 }
  0x6a   :  { %523 = vmatmul.mubr.bf16.gmra.mxu0 %v1578_v47 }
  0x6b   :  { %530 = vmatprep.mubr.bf16.mxu0 %v1582_v48 }
  0x72   :  { %531 = vmatmul.mubr.bf16.gmra.mxu0 %v1584_v51 }
  0x73   :  { %538 = vmatprep.mubr.bf16.mxu0 %v1588_v52 }
  0x7a   :  { %539 = vmatmul.mubr.bf16.gmra.mxu0 %v1590_v55 }
  0xe2   :  { %v1349_v56 = vpop.f32.mrf.mxu0  ;;  %v1813_v47 = vpop.f32.mrf.mxu1 }
  0xe4   :  { %v1350_v57 = vpop.f32.mrf.mxu0  ;;  %v1815_v54 = vpop.f32.mrf.mxu1 }
  0xe5   :  { %v1351_v58 = vadd.f32 %v1350_v57, %v1349_v56 }
  0xe6   :  { %v1352_v60 = vpop.f32.mrf.mxu0 }
  0xe7   :  { %v579_v62 = vadd.f32 %v1351_v58, %v1801_v59 }
  0xe8   :  { %v1353_v61 = vpop.f32.mrf.mxu0 }
  0xe9   :  { %v1354_v63 = vadd.f32 %v1353_v61, %v1352_v60  ;;  %v678_v3 = vmax.f32 %v579_v62, 0.0  ;;  %v1819_v61 = vpop.f32.mrf.mxu1 }
  0xea   :  { %v1355_v0 = vpop.f32.mrf.mxu0 }
  0xeb   :  { %v580_v1 = vadd.f32 %v1354_v63, %v1801_v59 }
  0xec   :  { %v1356_v2 = vpop.f32.mrf.mxu0 }
  0xed   :  { %v679_v4 = vmax.f32 %v580_v1, 0.0  ;;  %v1357_v5 = vadd.f32 %v1356_v2, %v1355_v0 }
  0xee   :  { %v1358_v6 = vpop.f32.mrf.mxu0 }
  0xef   :  { %v710_v7 = vpack.c.bf16 %v679_v4, %v678_v3  ;;  %v581_v9 = vadd.f32 %v1357_v5, %v1801_v59  ;;  %v1821_v4 = vpop.f32.mrf.mxu1 }
  0xf0   :  { %v1359_v8 = vpop.f32.mrf.mxu0 }
  0xf1   :  { %v1360_v10 = vadd.f32 %v1359_v8, %v1358_v6  ;;  %1485 = vmatprep.mubr.bf16.mxu1 %v710_v7  ;;  %v680_v14 = vmax.f32 %v581_v9, 0.0 }
  0xf2   :  { %v1361_v11 = vpop.f32.mrf.mxu0 }
  0xf3   :  { %v582_v12 = vadd.f32 %v1360_v10, %v1801_v59  ;;  %v1825_v10 = vpop.f32.mrf.mxu1 }
  0xf4   :  { %v1362_v13 = vpop.f32.mrf.mxu0 }
  0xf5   :  { %v681_v15 = vmax.f32 %v582_v12, 0.0  ;;  %v1363_v16 = vadd.f32 %v1362_v13, %v1361_v11 }
  0xf6   :  { %v1364_v17 = vpop.f32.mrf.mxu0 }
  0xf7   :  { %v711_v18 = vpack.c.bf16 %v681_v15, %v680_v14  ;;  %v583_v20 = vadd.f32 %v1363_v16, %v1801_v59 }
  0xf8   :  { %v1365_v19 = vpop.f32.mrf.mxu0 }
  0xf9   :  { %v1366_v21 = vadd.f32 %v1365_v19, %v1364_v17  ;;  %1486 = vmatmul.mubr.bf16.vlgmr.msra.gmra.mxu1 %v711_v18  ;;  %v682_v25 = vmax.f32 %v583_v20, 0.0  ;;  %v1827_v17 = vpop.f32.mrf.mxu1 }
  0xfa   :  { %v1367_v22 = vpop.f32.mrf.mxu0 }
  0xfb   :  { %v584_v23 = vadd.f32 %v1366_v21, %v1801_v59 }
  0xfc   :  { %v1368_v24 = vpop.f32.mrf.mxu0 }
  0xfd   :  { %v683_v26 = vmax.f32 %v584_v23, 0.0  ;;  %v1369_v27 = vadd.f32 %v1368_v24, %v1367_v22  ;;  %v1430_v23 = vpop.f32.mrf.mxu1 }
  0xfe   :  { %v1370_v28 = vpop.f32.mrf.mxu0 }
  0xff   :  { %v712_v29 = vpack.c.bf16 %v683_v26, %v682_v25  ;;  %v585_v31 = vadd.f32 %v1369_v27, %v1801_v59 }
 0x100   :  { %v1371_v30 = vpop.f32.mrf.mxu0 }
 0x101   :  { %v1372_v32 = vadd.f32 %v1371_v30, %v1370_v28  ;;  %1489 = vmatprep.mubr.bf16.mxu1 %v712_v29  ;;  %v684_v36 = vmax.f32 %v585_v31, 0.0  ;;  %v1431_v30 = vpop.f32.mrf.mxu1 }
 0x102   :  { %v1373_v33 = vpop.f32.mrf.mxu0 }
 0x103   :  { %v586_v34 = vadd.f32 %v1372_v32, %v1801_v59 }
 0x104   :  { %v1374_v35 = vpop.f32.mrf.mxu0 }
 0x105   :  { %v685_v37 = vmax.f32 %v586_v34, 0.0  ;;  %v1375_v38 = vadd.f32 %v1374_v35, %v1373_v33 }
 0x106   :  { %v1376_v39 = vpop.f32.mrf.mxu0 }
 0x107   :  { %v713_v40 = vpack.c.bf16 %v685_v37, %v684_v36  ;;  %v587_v42 = vadd.f32 %v1375_v38, %v1801_v59  ;;  %v1433_v36 = vpop.f32.mrf.mxu1 }
 0x108   :  { %v1377_v41 = vpop.f32.mrf.mxu0 }
 0x109   :  { %v1378_v43 = vadd.f32 %v1377_v41, %v1376_v39  ;;  %1490 = vmatmul.mubr.bf16.gmra.mxu1 %v713_v40  ;;  %v686_v48 = vmax.f32 %v587_v42, 0.0 }
 0x10a   :  { %v1379_v44 = vpop.f32.mrf.mxu0 }
 0x10b   :  { %v588_v45 = vadd.f32 %v1378_v43, %v1801_v59  ;;  %v1434_v43 = vpop.f32.mrf.mxu1 }
 0x10c   :  { %v1380_v46 = vpop.f32.mrf.mxu0 }
 0x10d   :  { %v687_v49 = vmax.f32 %v588_v45, 0.0  ;;  %v1381_v50 = vadd.f32 %v1380_v46, %v1379_v44 }
 0x10e   :  { %v1382_v51 = vpop.f32.mrf.mxu0 }
 0x10f   :  { %v714_v52 = vpack.c.bf16 %v687_v49, %v686_v48  ;;  %v589_v55 = vadd.f32 %v1381_v50, %v1801_v59  ;;  %v1436_v50 = vpop.f32.mrf.mxu1 }
 0x110   :  { %v1383_v53 = vpop.f32.mrf.mxu0 }
 0x111   :  { %v1384_v56 = vadd.f32 %v1383_v53, %v1382_v51  ;;  %1493 = vmatprep.mubr.bf16.mxu1 %v714_v52  ;;  %v688_v62 = vmax.f32 %v589_v55, 0.0 }
 0x112   :  { %v1385_v57 = vpop.f32.mrf.mxu0 }
 0x113   :  { %v590_v58 = vadd.f32 %v1384_v56, %v1801_v59 }
 0x114   :  { %v1386_v60 = vpop.f32.mrf.mxu0 }
 0x115   :  { %v689_v63 = vmax.f32 %v590_v58, 0.0  ;;  %v1387_v0 = vadd.f32 %v1386_v60, %v1385_v57  ;;  %v1437_v58 = vpop.f32.mrf.mxu1 }
 0x116   :  { %v1388_v1 = vpop.f32.mrf.mxu0 }
 0x117   :  { %v715_v2 = vpack.c.bf16 %v689_v63, %v688_v62  ;;  %v591_v5 = vadd.f32 %v1387_v0, %v1801_v59 }
 0x118   :  { %v1389_v3 = vpop.f32.mrf.mxu0 }
 0x119   :  { %v1390_v6 = vadd.f32 %v1389_v3, %v1388_v1  ;;  %1494 = vmatmul.mubr.bf16.gmra.mxu1 %v715_v2  ;;  %v690_v11 = vmax.f32 %v591_v5, 0.0  ;;  %v1423_v1 = vadd.f32 %v1815_v54, %v1813_v47  ;;  %v1426_v2 = vadd.f32 %v1821_v4, %v1819_v61  ;;  %v1439_v5 = vpop.f32.mrf.mxu1 }
 0x11a   :  { %v1391_v7 = vpop.f32.mrf.mxu0  ;;  %v1429_v47 = vadd.f32 %v1827_v17, %v1825_v10  ;;  %v1432_v54 = vadd.f32 %v1431_v30, %v1430_v23 }
 0x11b   :  { %v592_v8 = vadd.f32 %v1390_v6, %v1801_v59 }
 0x11c   :  { %v1392_v9 = vpop.f32.mrf.mxu0 }
 0x11d   :  { %v691_v12 = vmax.f32 %v592_v8, 0.0  ;;  %v1393_v13 = vadd.f32 %v1392_v9, %v1391_v7 }
 0x11e   :  { %v1394_v14 = vpop.f32.mrf.mxu0 }
 0x11f   :  { %v716_v15 = vpack.c.bf16 %v691_v12, %v690_v11  ;;  %v593_v18 = vadd.f32 %v1393_v13, %v1801_v59  ;;  %v603_v12 = vadd.f32 %v1423_v1, %v1801_v59  ;;  %v604_v13 = vadd.f32 %v1426_v2, %v1801_v59 }
 0x120   :  { %v1395_v16 = vpop.f32.mrf.mxu0 }
 0x121   :  { %v1396_v19 = vadd.f32 %v1395_v16, %v1394_v14  ;;  %1497 = vmatprep.mubr.bf16.mxu1 %v716_v15  ;;  %v692_v24 = vmax.f32 %v593_v18, 0.0  ;;  %v1440_v15 = vpop.f32.mrf.mxu1  ;;  %v702_v4 = vmax.f32 %v603_v12, 0.0 }
 0x122   :  { %v1397_v20 = vpop.f32.mrf.mxu0 }
 0x123   :  { %v594_v21 = vadd.f32 %v1396_v19, %v1801_v59  ;;  %v703_v19 = vmax.f32 %v604_v13, 0.0 }
 0x124   :  { %v1398_v22 = vpop.f32.mrf.mxu0 }
 0x125   :  { %v693_v25 = vmax.f32 %v594_v21, 0.0  ;;  %v1399_v26 = vadd.f32 %v1398_v22, %v1397_v20  ;;  %v1435_v20 = vadd.f32 %v1434_v43, %v1433_v36  ;;  %v1438_v21 = vadd.f32 %v1437_v58, %v1436_v50  ;;  %v1442_v22 = vpop.f32.mrf.mxu1 }
 0x126   :  { %v1400_v27 = vpop.f32.mrf.mxu0  ;;  %v722_v17 = vpack.c.bf16 %v703_v19, %v702_v4 }
 0x127   :  { %v717_v28 = vpack.c.bf16 %v693_v25, %v692_v24  ;;  %v595_v31 = vadd.f32 %v1399_v26, %v1801_v59  ;;  %v605_v26 = vadd.f32 %v1429_v47, %v1801_v59  ;;  %v1443_v10 = vpop.f32.mrf.mxu1 }
 0x128   :  { %v1401_v29 = vpop.f32.mrf.mxu0 }
 0x129   :  { %v1402_v32 = vadd.f32 %v1401_v29, %v1400_v27  ;;  %1498 = vmatmul.mubr.bf16.gmra.mxu1 %v717_v28  ;;  %v694_v37 = vmax.f32 %v595_v31, 0.0  ;;  %v606_v27 = vadd.f32 %v1432_v54, %v1801_v59  ;;  %v607_v29 = vadd.f32 %v1435_v20, %v1801_v59 }
 0x12a   :  { %v1403_v33 = vpop.f32.mrf.mxu0  ;;  %v608_v31 = vadd.f32 %v1438_v21, %v1801_v59  ;;  %v704_v23 = vmax.f32 %v605_v26, 0.0 }
 0x12b   :  { %v596_v34 = vadd.f32 %v1402_v32, %v1801_v59  ;;  %v705_v30 = vmax.f32 %v606_v27, 0.0  ;;  %v1441_v32 = vadd.f32 %v1440_v15, %v1439_v5 }
 0x12c   :  { %v1404_v35 = vpop.f32.mrf.mxu0 }
 0x12d   :  { %v695_v38 = vmax.f32 %v596_v34, 0.0  ;;  %v1405_v39 = vadd.f32 %v1404_v35, %v1403_v33  ;;  %v1444_v33 = vadd.f32 %v1443_v10, %v1442_v22  ;;  %v706_v34 = vmax.f32 %v607_v29, 0.0 }
 0x12e   :  { %v1406_v40 = vpop.f32.mrf.mxu0  ;;  %v707_v35 = vmax.f32 %v608_v31, 0.0  ;;  %v609_v36 = vadd.f32 %v1441_v32, %v1801_v59 }
 0x12f   :  { %v718_v41 = vpack.c.bf16 %v695_v38, %v694_v37  ;;  %v597_v44 = vadd.f32 %v1405_v39, %v1801_v59  ;;  %v610_v37 = vadd.f32 %v1444_v33, %v1801_v59  ;;  %v723_v38 = vpack.c.bf16 %v705_v30, %v704_v23 }
 0x130   :  { %v1407_v42 = vpop.f32.mrf.mxu0  ;;  %v724_v39 = vpack.c.bf16 %v707_v35, %v706_v34 }
 0x131   :  { %v1408_v45 = vadd.f32 %v1407_v42, %v1406_v40  ;;  %1501 = vmatprep.mubr.bf16.mxu1 %v718_v41  ;;  %v696_v51 = vmax.f32 %v597_v44, 0.0  ;;  %v708_v40 = vmax.f32 %v609_v36, 0.0  ;;  %v709_v41 = vmax.f32 %v610_v37, 0.0 }
 0x132   :  { %v1409_v46 = vpop.f32.mrf.mxu0 }
 0x133   :  { %v598_v48 = vadd.f32 %v1408_v45, %v1801_v59  ;;  %v725_v42 = vpack.c.bf16 %v709_v41, %v708_v40 }
 0x134   :  { %v1410_v49 = vpop.f32.mrf.mxu0 }
 0x135   :  { %v697_v52 = vmax.f32 %v598_v48, 0.0  ;;  %v1411_v53 = vadd.f32 %v1410_v49, %v1409_v46 }
 0x136   :  { %v1412_v55 = vpop.f32.mrf.mxu0 }
 0x137   :  { %v719_v56 = vpack.c.bf16 %v697_v52, %v696_v51  ;;  %v599_v60 = vadd.f32 %v1411_v53, %v1801_v59 }
 0x138   :  { %v1413_v57 = vpop.f32.mrf.mxu0 }
 0x139   :  { %v1414_v62 = vadd.f32 %v1413_v57, %v1412_v55  ;;  %1502 = vmatmul.mubr.bf16.gmra.mxu1 %v719_v56  ;;  %v698_v6 = vmax.f32 %v599_v60, 0.0 }
 0x13a   :  { %v1415_v63 = vpop.f32.mrf.mxu0 }
 0x13b   :  { %v600_v0 = vadd.f32 %v1414_v62, %v1801_v59 }
 0x13c   :  { %v1416_v3 = vpop.f32.mrf.mxu0 }
 0x13d   :  { %v699_v7 = vmax.f32 %v600_v0, 0.0  ;;  %v1417_v8 = vadd.f32 %v1416_v3, %v1415_v63 }
 0x13e   :  { %v1418_v9 = vpop.f32.mrf.mxu0 }
 0x13f   :  { %v720_v11 = vpack.c.bf16 %v699_v7, %v698_v6  ;;  %v601_v16 = vadd.f32 %v1417_v8, %v1801_v59 }
 0x140   :  { %v1419_v14 = vpop.f32.mrf.mxu0 }
 0x141   :  { %v1420_v18 = vadd.f32 %v1419_v14, %v1418_v9  ;;  %1505 = vmatprep.mubr.bf16.mxu1 %v720_v11  ;;  %v700_v24 = vmax.f32 %v601_v16, 0.0 }
 0x143   :  { %v602_v61 = vadd.f32 %v1420_v18, %v1801_v59 }
 0x145   :  { %v701_v25 = vmax.f32 %v602_v61, 0.0 }
 0x147   :  { %v721_v28 = vpack.c.bf16 %v701_v25, %v700_v24 }
 0x149   :  { %1506 = vmatmul.mubr.bf16.gmra.mxu1 %v721_v28 }
 0x14a   :  { %1509 = vmatprep.mubr.bf16.mxu1 %v722_v17 }
 0x151   :  { %1510 = vmatmul.mubr.bf16.gmra.mxu1 %v723_v38 }
 0x152   :  { %1513 = vmatprep.mubr.bf16.mxu1 %v724_v39 }
 0x159   :  { %1514 = vmatmul.mubr.bf16.gmra.mxu1 %v725_v42 }
 0x1b9   :  { %v1487_v43 = vpop.f32.mrf.mxu1 }
 0x1bb   :  { %v824_v44 = vpop.f32.mrf.mxu1 }
 0x1bd   :  { %v1488_v45 = vpop.f32.mrf.mxu1 }
 0x1be   :  { %v1246_v46 = vpack.c.bf16 %v1488_v45, %v1487_v43 }
 0x1bf   :  { %v827_v48 = vpop.f32.mrf.mxu1 }
 0x1c0   :  { %1318 = vst [vmem:[%s1905_s4 + $0x8] sm:$0xff] %v1246_v46   ;;  %v1241_v49 = vpack.c.bf16 %v827_v48, %v824_v44 }
 0x1c2   :  { %1242 = vst [vmem:[%s1905_s4] sm:$0xff] %v1241_v49  }
 0x1c9   :  { %v1491_v59 = vpop.f32.mrf.mxu1 }
 0x1cb   :  { %v840_v50 = vpop.f32.mrf.mxu1 }
 0x1cd   :  { %v1492_v51 = vpop.f32.mrf.mxu1 }
 0x1ce   :  { %v1256_v52 = vpack.c.bf16 %v1492_v51, %v1491_v59 }
 0x1cf   :  { %v843_v53 = vpop.f32.mrf.mxu1 }
 0x1d0   :  { %1320 = vst [vmem:[%s1905_s4 + $0x18] sm:$0xff] %v1256_v52   ;;  %v1251_v55 = vpack.c.bf16 %v843_v53, %v840_v50 }
 0x1d2   :  { %1319 = vst [vmem:[%s1905_s4 + $0x10] sm:$0xff] %v1251_v55  }
 0x1d9   :  { %v1495_v56 = vpop.f32.mrf.mxu1 }
 0x1db   :  { %v856_v57 = vpop.f32.mrf.mxu1 }
 0x1dd   :  { %v1496_v58 = vpop.f32.mrf.mxu1 }
 0x1de   :  { %v1266_v60 = vpack.c.bf16 %v1496_v58, %v1495_v56 }
 0x1df   :  { %v859_v62 = vpop.f32.mrf.mxu1 }
 0x1e0   :  { %1322 = vst [vmem:[%s1905_s4 + $0x28] sm:$0xff] %v1266_v60   ;;  %v1261_v63 = vpack.c.bf16 %v859_v62, %v856_v57 }
 0x1e2   :  { %1321 = vst [vmem:[%s1905_s4 + $0x20] sm:$0xff] %v1261_v63  }
 0x1e9   :  { %v1499_v0 = vpop.f32.mrf.mxu1 }
 0x1eb   :  { %v872_v1 = vpop.f32.mrf.mxu1 }
 0x1ed   :  { %v1500_v2 = vpop.f32.mrf.mxu1 }
 0x1ee   :  { %v1276_v3 = vpack.c.bf16 %v1500_v2, %v1499_v0 }
 0x1ef   :  { %v875_v5 = vpop.f32.mrf.mxu1 }
 0x1f0   :  { %1324 = vst [vmem:[%s1905_s4 + $0x38] sm:$0xff] %v1276_v3   ;;  %v1271_v6 = vpack.c.bf16 %v875_v5, %v872_v1 }
 0x1f2   :  { %1323 = vst [vmem:[%s1905_s4 + $0x30] sm:$0xff] %v1271_v6  }
 0x1f9   :  { %v1503_v7 = vpop.f32.mrf.mxu1 }
 0x1fb   :  { %v888_v8 = vpop.f32.mrf.mxu1 }
 0x1fd   :  { %v1504_v9 = vpop.f32.mrf.mxu1 }
 0x1fe   :  { %v1286_v11 = vpack.c.bf16 %v1504_v9, %v1503_v7 }
 0x1ff   :  { %v891_v12 = vpop.f32.mrf.mxu1 }
 0x200   :  { %1326 = vst [vmem:[%s1905_s4 + $0x48] sm:$0xff] %v1286_v11   ;;  %v1281_v13 = vpack.c.bf16 %v891_v12, %v888_v8 }
 0x202   :  { %1325 = vst [vmem:[%s1905_s4 + $0x40] sm:$0xff] %v1281_v13  }
 0x209   :  { %v1507_v14 = vpop.f32.mrf.mxu1 }
 0x20b   :  { %v904_v15 = vpop.f32.mrf.mxu1 }
 0x20d   :  { %v1508_v16 = vpop.f32.mrf.mxu1 }
 0x20e   :  { %v1296_v18 = vpack.c.bf16 %v1508_v16, %v1507_v14 }
 0x20f   :  { %v907_v47 = vpop.f32.mrf.mxu1 }
 0x210   :  { %1328 = vst [vmem:[%s1905_s4 + $0x58] sm:$0xff] %v1296_v18   ;;  %v1291_v54 = vpack.c.bf16 %v907_v47, %v904_v15 }
 0x211   :  { %v1511_v61 = vpop.f32.mrf.mxu1 }
 0x212   :  { %1327 = vst [vmem:[%s1905_s4 + $0x50] sm:$0xff] %v1291_v54  }
 0x213   :  { %v920_v4 = vpop.f32.mrf.mxu1 }
 0x215   :  { %v1512_v19 = vpop.f32.mrf.mxu1 }
 0x216   :  { %v1306_v20 = vpack.c.bf16 %v1512_v19, %v1511_v61 }
 0x217   :  { %v923_v21 = vpop.f32.mrf.mxu1 }
 0x218   :  { %1330 = vst [vmem:[%s1905_s4 + $0x68] sm:$0xff] %v1306_v20   ;;  %v1301_v22 = vpack.c.bf16 %v923_v21, %v920_v4 }
 0x219   :  { %v1515_v24 = vpop.f32.mrf.mxu1 }
 0x21a   :  { %1329 = vst [vmem:[%s1905_s4 + $0x60] sm:$0xff] %v1301_v22  }
 0x21b   :  { %v936_v25 = vpop.f32.mrf.mxu1 }
 0x21d   :  { %v1516_v26 = vpop.f32.mrf.mxu1 }
 0x21e   :  { %v1316_v27 = vpack.c.bf16 %v1516_v26, %v1515_v24 }
 0x21f   :  { %v939_v28 = vpop.f32.mrf.mxu1 }
 0x220   :  { %1332 = vst [vmem:[%s1905_s4 + $0x78] sm:$0xff] %v1316_v27   ;;  %v1311_v29 = vpack.c.bf16 %v939_v28, %v936_v25 }
 0x222   :  { %1331 = vst [vmem:[%s1905_s4 + $0x70] sm:$0xff] %v1311_v29  }

</bundles_post_ra>
